<compile_context>
chip_gen: v7x
topology: tpu7x:2x2x1
jax: 0.10.0
libtpu: 0.0.40
codegen_flags: <defaults>
</compile_context>

<pallas_src>
import jax
import jax.numpy as jnp
from jax.experimental import pallas as pl
from jax.experimental.pallas import tpu as pltpu


# ---------------------------------------------------------------------------
# Config (small shapes consistent with the module)
# ---------------------------------------------------------------------------
B = 2             # batch
L = 8             # sequence length
C_IN = 24         # lm_representation channels (c_in)
EMBED = 32        # embed_dim  -> attention dim = 2 * embed_dim = 64
HEADS = 8         # num_attn_heads
D2 = 2 * EMBED    # 64
HD = D2 // HEADS  # 8
BL = B * L        # 16 rows after flattening
C_OUT = 5         # linear_out width
LANES = 128
C_IN_PAD = 32     # lm lanes padded to a bf16 sublane-tile multiple

# Weight-pack row offsets (all multiples of 16 = bf16 sublane tile).
R_WSEQ = 0
R_WO = R_WSEQ + C_IN_PAD       # 32
R_W1 = R_WO + D2               # 96
R_W2 = R_W1 + LANES            # 224
R_W3 = R_W2 + LANES            # 352
R_W4 = R_W3 + LANES            # 480
R_WOUT = R_W4 + LANES          # 608
R_TOTAL = R_WOUT + LANES       # 736

# Bias-pack row indices (buffer is [8, 192] f32).
RB_SEQ, RB_QKV, RB_OUTB, RB_B1, RB_B2, RB_B3, RB_B4, RB_BOUT = range(8)


def _elu(x):
    # clamp the exp argument so the discarded positive branch never overflows
    return jnp.where(x > 0, x, jnp.exp(jnp.minimum(x, 0.0)) - 1.0)


# ---------------------------------------------------------------------------
# Pallas kernel: whole forward pass, one invocation, all rows at once
# ---------------------------------------------------------------------------
def _mdlm_head_kernel(lm_ref, pos_ref, mask_ref, w_ref, wqkv_ref, b_ref, o_ref):
    f32 = jnp.float32
    bf16 = jnp.bfloat16

    # linear_in_seq + positional encoding (all activations are 128 lanes wide;
    # lanes >= 64 stay exactly zero through the whole network)
    x = jnp.dot(lm_ref[...].astype(bf16), w_ref[R_WSEQ:R_WSEQ + C_IN_PAD, :],
                preferred_element_type=f32)
    x = x + b_ref[RB_SEQ:RB_SEQ + 1, 0:LANES] + pos_ref[...]          # [BL,128]

    # fused q/k/v projection: one lane-dense MXU push (scale folded into q)
    qkv = jnp.dot(x.astype(bf16), wqkv_ref[...], preferred_element_type=f32)
    qkv = qkv + b_ref[RB_QKV:RB_QKV + 1, :]                           # [BL,192]

    mask = mask_ref[...]                                              # [BL,BL]

    # per-head attention (static unrolled loop, 8 heads)
    ctx_parts = []
    for h in range(HEADS):
        qh = qkv[:, h * HD:(h + 1) * HD]                              # [BL,HD]
        kh = qkv[:, D2 + h * HD:D2 + (h + 1) * HD]
        vh = qkv[:, 2 * D2 + h * HD:2 * D2 + (h + 1) * HD]
        s = jax.lax.dot_general(qh.astype(bf16), kh.astype(bf16),
                                (((1,), (1,)), ((), ())),
                                preferred_element_type=f32)           # [BL,BL]
        s = s + mask
        s = s - jnp.max(s, axis=-1, keepdims=True)
        p = jnp.exp(s)
        p = p * pl.reciprocal(jnp.sum(p, axis=-1, keepdims=True), approx=True)
        ctx_parts.append(jnp.dot(p.astype(bf16), vh.astype(bf16),
                                 preferred_element_type=f32))         # [BL,HD]

    # heads back along lanes -> single K=64 out-projection (no partial sums)
    ctx = jnp.concatenate(ctx_parts, axis=1)                          # [BL,D2]
    attn = jnp.dot(ctx.astype(bf16), w_ref[R_WO:R_WO + D2, :],
                   preferred_element_type=f32)
    attn = attn + b_ref[RB_OUTB:RB_OUTB + 1, 0:LANES]                 # [BL,128]

    # bottleneck MLP on full 128-lane slabs (dropout = identity in eval)
    h1 = _elu(jnp.dot(attn.astype(bf16), w_ref[R_W1:R_W1 + LANES, :],
                      preferred_element_type=f32)
              + b_ref[RB_B1:RB_B1 + 1, 0:LANES])
    h2 = _elu(jnp.dot(h1.astype(bf16), w_ref[R_W2:R_W2 + LANES, :],
                      preferred_element_type=f32)
              + b_ref[RB_B2:RB_B2 + 1, 0:LANES])
    h3 = _elu(jnp.dot(h2.astype(bf16), w_ref[R_W3:R_W3 + LANES, :],
                      preferred_element_type=f32)
              + b_ref[RB_B3:RB_B3 + 1, 0:LANES])
    h4 = (jnp.dot(h3.astype(bf16), w_ref[R_W4:R_W4 + LANES, :],
                  preferred_element_type=f32)
          + b_ref[RB_B4:RB_B4 + 1, 0:LANES])

    y = h4 + x                                                        # residual

    # linear_out, lane-dense unmasked store (cols >= 5 are zero by construction)
    o_ref[...] = (jnp.dot(y.astype(bf16), w_ref[R_WOUT:R_WOUT + LANES, :],
                          preferred_element_type=f32)
                  + b_ref[RB_BOUT:RB_BOUT + 1, 0:LANES])


# ---------------------------------------------------------------------------
# Host-side parameter packing (done ONCE; weights [in, out], biases [out])
# ---------------------------------------------------------------------------
def pack_params(p):
    w = jnp.zeros((R_TOTAL, LANES), jnp.float32)
    w = w.at[R_WSEQ:R_WSEQ + C_IN, 0:D2].set(p["w_seq"])
    w = w.at[R_WO:R_WO + D2, 0:D2].set(p["out_w"])
    w = w.at[R_W1:R_W1 + D2, 0:EMBED].set(p["w1"])
    w = w.at[R_W2:R_W2 + EMBED, 0:EMBED // 2].set(p["w2"])
    w = w.at[R_W3:R_W3 + EMBED // 2, 0:EMBED].set(p["w3"])
    w = w.at[R_W4:R_W4 + EMBED, 0:D2].set(p["w4"])
    w = w.at[R_WOUT:R_WOUT + D2, 0:C_OUT].set(p["w_out"])

    scale = 1.0 / (HD ** 0.5)                 # fold score scale into q weights
    wqkv = jnp.zeros((LANES, 3 * D2), jnp.float32)
    wqkv = wqkv.at[0:D2, 0:D2].set(p["w_q"] * scale)
    wqkv = wqkv.at[0:D2, D2:2 * D2].set(p["w_k"])
    wqkv = wqkv.at[0:D2, 2 * D2:3 * D2].set(p["w_v"])

    b = jnp.zeros((8, 3 * D2), jnp.float32)
    b = b.at[RB_SEQ, 0:D2].set(p["b_seq"])
    b = b.at[RB_QKV, 0:D2].set(p["b_q"] * scale)
    b = b.at[RB_QKV, D2:2 * D2].set(p["b_k"])
    b = b.at[RB_QKV, 2 * D2:3 * D2].set(p["b_v"])
    b = b.at[RB_OUTB, 0:D2].set(p["out_b"])
    b = b.at[RB_B1, 0:EMBED].set(p["b1"])
    b = b.at[RB_B2, 0:EMBED // 2].set(p["b2"])
    b = b.at[RB_B3, 0:EMBED].set(p["b3"])
    b = b.at[RB_B4, 0:D2].set(p["b4"])
    b = b.at[RB_BOUT, 0:C_OUT].set(p["b_out"])

    return w.astype(jnp.bfloat16), wqkv.astype(jnp.bfloat16), b


# ---------------------------------------------------------------------------
# Jitted wrapper (mask build + padding + one pallas_call)
# ---------------------------------------------------------------------------
@jax.jit
def mdlm_head_forward(lm, pos, pad_mask, packed):
    w, wqkv, b = packed
    bsz, seq_len, _ = lm.shape
    bl = bsz * seq_len

    lm2 = jnp.pad(lm.reshape(bl, C_IN).astype(jnp.float32),
                  ((0, 0), (0, C_IN_PAD - C_IN)))                    # [BL,32]
    pos2 = jnp.pad(pos.reshape(bl, D2).astype(jnp.float32),
                   ((0, 0), (0, LANES - D2)))                        # [BL,128]

    # Additive mask: block-diagonal over batches fused with key padding.
    batch_ids = jnp.arange(bl, dtype=jnp.int32) // seq_len
    same_batch = batch_ids[:, None] == batch_ids[None, :]
    key_valid = jnp.logical_not(pad_mask.reshape(bl))
    mask_add = jnp.where(same_batch & key_valid[None, :],
                         0.0, -1e9).astype(jnp.float32)              # [BL,BL]

    vmem = lambda: pl.BlockSpec(memory_space=pltpu.MemorySpace.VMEM)
    out = pl.pallas_call(
        _mdlm_head_kernel,
        out_shape=jax.ShapeDtypeStruct((bl, LANES), jnp.float32),
        in_specs=[vmem() for _ in range(6)],
        out_specs=vmem(),
    )(lm2, pos2, mask_add, w, wqkv, b)

    return out[:, 0:C_OUT].reshape(bsz, seq_len, C_OUT)


# ---------------------------------------------------------------------------
# Pure-JAX reference (mirrors the PyTorch forward, eval mode, f32)
# ---------------------------------------------------------------------------
def reference(lm, pos, pad_mask, p):
    x = lm @ p["w_seq"] + p["b_seq"]
    x = x + pos                                   # x_seq_input
    bb, ll, d2 = x.shape
    hd = d2 // HEADS

    q = x @ p["w_q"] + p["b_q"]
    k = x @ p["w_k"] + p["b_k"]
    v = x @ p["w_v"] + p["b_v"]
    qh = q.reshape(bb, ll, HEADS, hd).transpose(0, 2, 1, 3)
    kh = k.reshape(bb, ll, HEADS, hd).transpose(0, 2, 1, 3)
    vh = v.reshape(bb, ll, HEADS, hd).transpose(0, 2, 1, 3)
    s = jnp.einsum("bhqd,bhkd->bhqk", qh, kh) / jnp.sqrt(hd)
    s = s + jnp.where(pad_mask[:, None, None, :], -1e9, 0.0)
    a = jax.nn.softmax(s, axis=-1)
    o = jnp.einsum("bhqk,bhkd->bhqd", a, vh).transpose(0, 2, 1, 3).reshape(bb, ll, d2)
    o = o @ p["out_w"] + p["out_b"]

    h = jax.nn.elu(o @ p["w1"] + p["b1"])
    h = jax.nn.elu(h @ p["w2"] + p["b2"])
    h = jax.nn.elu(h @ p["w3"] + p["b3"])
    h = h @ p["w4"] + p["b4"]
    x = h + x
    return x @ p["w_out"] + p["b_out"]


# ---------------------------------------------------------------------------
# Deterministic parameter init (weights [in, out], biases [out])
# ---------------------------------------------------------------------------
def init_params(key):
    shapes = {
        "w_seq": (C_IN, D2), "b_seq": (D2,),
        "w_q": (D2, D2), "b_q": (D2,),
        "w_k": (D2, D2), "b_k": (D2,),
        "w_v": (D2, D2), "b_v": (D2,),
        "out_w": (D2, D2), "out_b": (D2,),
        "w1": (D2, EMBED), "b1": (EMBED,),
        "w2": (EMBED, EMBED // 2), "b2": (EMBED // 2,),
        "w3": (EMBED // 2, EMBED), "b3": (EMBED,),
        "w4": (EMBED, D2), "b4": (D2,),
        "w_out": (D2, C_OUT), "b_out": (C_OUT,),
    }
    params = {}
    keys = jax.random.split(key, len(shapes))
    for k, (name, shp) in zip(keys, shapes.items()):
        params[name] = jax.random.normal(k, shp, jnp.float32) * 0.05
    return params


if __name__ == "__main__":
    root = jax.random.PRNGKey(0)
    k_lm, k_pos, k_par = jax.random.split(root, 3)

    lm = jax.random.normal(k_lm, (B, L, C_IN), jnp.float32)
    pos = jax.random.normal(k_pos, (B, L, D2), jnp.float32) * 0.1
    pad_mask = jnp.array(
        [[False] * L,
         [False] * (L - 2) + [True] * 2])          # True = padded key position

    params = init_params(k_par)
    packed = pack_params(params)                   # packed once, reused per call

    out = mdlm_head_forward(lm, pos, pad_mask, packed)
    out = jax.block_until_ready(out)

    ref = reference(lm, pos, pad_mask, params)
    assert out.shape == (B, L, C_OUT), out.shape
    max_err = float(jnp.max(jnp.abs(out - ref)))
    assert jnp.allclose(out, ref, atol=1e-2, rtol=1e-2), max_err

    print("KERNEL_OK")
</pallas_src>

<mosaic_0001>
module attributes {stable_mosaic.version = 11 : i64} {
  func.func @_mdlm_head_kernel(%arg0: memref<16x32xf32, #tpu.memory_space<vmem>>, %arg1: memref<16x128xf32, #tpu.memory_space<vmem>>, %arg2: memref<16x16xf32, #tpu.memory_space<vmem>>, %arg3: memref<736x128xbf16, #tpu.memory_space<vmem>>, %arg4: memref<128x192xbf16, #tpu.memory_space<vmem>>, %arg5: memref<8x192xf32, #tpu.memory_space<vmem>>, %arg6: memref<16x128xf32, #tpu.memory_space<vmem>>) attributes {dimension_semantics = [], scalar_prefetch = 0 : i64, scratch_operands = 0 : i64, tpu.core_type = #tpu.core_type<tc>} {
    %c0 = arith.constant 0 : index
    %c0_0 = arith.constant 0 : index
    %0 = vector.load %arg0[%c0, %c0_0] : memref<16x32xf32, #tpu.memory_space<vmem>>, vector<16x32xf32>
    %1 = arith.truncf %0 : vector<16x32xf32> to vector<16x32xbf16>
    %c0_1 = arith.constant 0 : index
    %c0_2 = arith.constant 0 : index
    %2 = vector.load %arg3[%c0_1, %c0_2] : memref<736x128xbf16, #tpu.memory_space<vmem>>, vector<32x128xbf16>
    %cst = arith.constant dense<0.000000e+00> : vector<16x128xf32>
    %3 = tpu.matmul %1, %2, %cst {dimension_numbers = #tpu.dot_dimension_numbers<[1], [0], [0], [1], [0, 0, 1, 1], [], []>} : vector<16x32xbf16>, vector<32x128xbf16>, vector<16x128xf32> -> vector<16x128xf32>
    %c0_3 = arith.constant 0 : index
    %c0_4 = arith.constant 0 : index
    %4 = vector.load %arg5[%c0_3, %c0_4] : memref<8x192xf32, #tpu.memory_space<vmem>>, vector<1x128xf32>
    %5 = vector.broadcast %4 : vector<1x128xf32> to vector<16x128xf32>
    %6 = arith.addf %3, %5 : vector<16x128xf32>
    %c0_5 = arith.constant 0 : index
    %c0_6 = arith.constant 0 : index
    %7 = vector.load %arg1[%c0_5, %c0_6] : memref<16x128xf32, #tpu.memory_space<vmem>>, vector<16x128xf32>
    %8 = arith.addf %6, %7 : vector<16x128xf32>
    %9 = arith.truncf %8 : vector<16x128xf32> to vector<16x128xbf16>
    %c0_7 = arith.constant 0 : index
    %c0_8 = arith.constant 0 : index
    %10 = vector.load %arg4[%c0_7, %c0_8] : memref<128x192xbf16, #tpu.memory_space<vmem>>, vector<128x192xbf16>
    %cst_9 = arith.constant dense<0.000000e+00> : vector<16x192xf32>
    %11 = tpu.matmul %9, %10, %cst_9 {dimension_numbers = #tpu.dot_dimension_numbers<[1], [0], [0], [1], [0, 0, 1, 1], [], []>} : vector<16x128xbf16>, vector<128x192xbf16>, vector<16x192xf32> -> vector<16x192xf32>
    %c1 = arith.constant 1 : index
    %c0_10 = arith.constant 0 : index
    %12 = vector.load %arg5[%c1, %c0_10] : memref<8x192xf32, #tpu.memory_space<vmem>>, vector<1x192xf32>
    %13 = vector.broadcast %12 : vector<1x192xf32> to vector<16x192xf32>
    %14 = arith.addf %11, %13 : vector<16x192xf32>
    %c0_11 = arith.constant 0 : index
    %c0_12 = arith.constant 0 : index
    %15 = vector.load %arg2[%c0_11, %c0_12] : memref<16x16xf32, #tpu.memory_space<vmem>>, vector<16x16xf32>
    %16 = vector.extract_strided_slice %14 {offsets = [0, 0], sizes = [16, 8], strides = [1, 1]} : vector<16x192xf32> to vector<16x8xf32>
    %17 = vector.extract_strided_slice %14 {offsets = [0, 64], sizes = [16, 8], strides = [1, 1]} : vector<16x192xf32> to vector<16x8xf32>
    %18 = vector.extract_strided_slice %14 {offsets = [0, 128], sizes = [16, 8], strides = [1, 1]} : vector<16x192xf32> to vector<16x8xf32>
    %19 = arith.truncf %16 : vector<16x8xf32> to vector<16x8xbf16>
    %20 = arith.truncf %17 : vector<16x8xf32> to vector<16x8xbf16>
    %cst_13 = arith.constant dense<0.000000e+00> : vector<16x16xf32>
    %21 = tpu.matmul %19, %20, %cst_13 {dimension_numbers = #tpu.dot_dimension_numbers<[1], [1], [0], [0], [0, 0, 1, 0], [], []>} : vector<16x8xbf16>, vector<16x8xbf16>, vector<16x16xf32> -> vector<16x16xf32>
    %22 = arith.addf %21, %15 : vector<16x16xf32>
    %cst_14 = arith.constant dense<0xFF800000> : vector<16xf32>
    %23 = vector.multi_reduction <maximumf>, %22, %cst_14 [1] : vector<16x16xf32> to vector<16xf32>
    %24 = vector.shape_cast %23 : vector<16xf32> to vector<16x1xf32>
    %25 = vector.broadcast %24 : vector<16x1xf32> to vector<16x16xf32>
    %26 = arith.subf %22, %25 : vector<16x16xf32>
    %27 = math.exp %26 : vector<16x16xf32>
    %cst_15 = arith.constant dense<0.000000e+00> : vector<16xf32>
    %28 = vector.multi_reduction <add>, %27, %cst_15 [1] : vector<16x16xf32> to vector<16xf32>
    %29 = vector.shape_cast %28 : vector<16xf32> to vector<16x1xf32>
    %30 = tpu.reciprocal %29 {approx = true} : vector<16x1xf32> -> vector<16x1xf32>
    %31 = vector.broadcast %30 : vector<16x1xf32> to vector<16x16xf32>
    %32 = arith.mulf %27, %31 : vector<16x16xf32>
    %33 = arith.truncf %32 : vector<16x16xf32> to vector<16x16xbf16>
    %34 = arith.truncf %18 : vector<16x8xf32> to vector<16x8xbf16>
    %cst_16 = arith.constant dense<0.000000e+00> : vector<16x8xf32>
    %35 = tpu.matmul %33, %34, %cst_16 {dimension_numbers = #tpu.dot_dimension_numbers<[1], [0], [0], [1], [0, 0, 1, 1], [], []>} : vector<16x16xbf16>, vector<16x8xbf16>, vector<16x8xf32> -> vector<16x8xf32>
    %36 = vector.extract_strided_slice %14 {offsets = [0, 8], sizes = [16, 8], strides = [1, 1]} : vector<16x192xf32> to vector<16x8xf32>
    %37 = vector.extract_strided_slice %14 {offsets = [0, 72], sizes = [16, 8], strides = [1, 1]} : vector<16x192xf32> to vector<16x8xf32>
    %38 = vector.extract_strided_slice %14 {offsets = [0, 136], sizes = [16, 8], strides = [1, 1]} : vector<16x192xf32> to vector<16x8xf32>
    %39 = arith.truncf %36 : vector<16x8xf32> to vector<16x8xbf16>
    %40 = arith.truncf %37 : vector<16x8xf32> to vector<16x8xbf16>
    %cst_17 = arith.constant dense<0.000000e+00> : vector<16x16xf32>
    %41 = tpu.matmul %39, %40, %cst_17 {dimension_numbers = #tpu.dot_dimension_numbers<[1], [1], [0], [0], [0, 0, 1, 0], [], []>} : vector<16x8xbf16>, vector<16x8xbf16>, vector<16x16xf32> -> vector<16x16xf32>
    %42 = arith.addf %41, %15 : vector<16x16xf32>
    %cst_18 = arith.constant dense<0xFF800000> : vector<16xf32>
    %43 = vector.multi_reduction <maximumf>, %42, %cst_18 [1] : vector<16x16xf32> to vector<16xf32>
    %44 = vector.shape_cast %43 : vector<16xf32> to vector<16x1xf32>
    %45 = vector.broadcast %44 : vector<16x1xf32> to vector<16x16xf32>
    %46 = arith.subf %42, %45 : vector<16x16xf32>
    %47 = math.exp %46 : vector<16x16xf32>
    %cst_19 = arith.constant dense<0.000000e+00> : vector<16xf32>
    %48 = vector.multi_reduction <add>, %47, %cst_19 [1] : vector<16x16xf32> to vector<16xf32>
    %49 = vector.shape_cast %48 : vector<16xf32> to vector<16x1xf32>
    %50 = tpu.reciprocal %49 {approx = true} : vector<16x1xf32> -> vector<16x1xf32>
    %51 = vector.broadcast %50 : vector<16x1xf32> to vector<16x16xf32>
    %52 = arith.mulf %47, %51 : vector<16x16xf32>
    %53 = arith.truncf %52 : vector<16x16xf32> to vector<16x16xbf16>
    %54 = arith.truncf %38 : vector<16x8xf32> to vector<16x8xbf16>
    %cst_20 = arith.constant dense<0.000000e+00> : vector<16x8xf32>
    %55 = tpu.matmul %53, %54, %cst_20 {dimension_numbers = #tpu.dot_dimension_numbers<[1], [0], [0], [1], [0, 0, 1, 1], [], []>} : vector<16x16xbf16>, vector<16x8xbf16>, vector<16x8xf32> -> vector<16x8xf32>
    %56 = vector.extract_strided_slice %14 {offsets = [0, 16], sizes = [16, 8], strides = [1, 1]} : vector<16x192xf32> to vector<16x8xf32>
    %57 = vector.extract_strided_slice %14 {offsets = [0, 80], sizes = [16, 8], strides = [1, 1]} : vector<16x192xf32> to vector<16x8xf32>
    %58 = vector.extract_strided_slice %14 {offsets = [0, 144], sizes = [16, 8], strides = [1, 1]} : vector<16x192xf32> to vector<16x8xf32>
    %59 = arith.truncf %56 : vector<16x8xf32> to vector<16x8xbf16>
    %60 = arith.truncf %57 : vector<16x8xf32> to vector<16x8xbf16>
    %cst_21 = arith.constant dense<0.000000e+00> : vector<16x16xf32>
    %61 = tpu.matmul %59, %60, %cst_21 {dimension_numbers = #tpu.dot_dimension_numbers<[1], [1], [0], [0], [0, 0, 1, 0], [], []>} : vector<16x8xbf16>, vector<16x8xbf16>, vector<16x16xf32> -> vector<16x16xf32>
    %62 = arith.addf %61, %15 : vector<16x16xf32>
    %cst_22 = arith.constant dense<0xFF800000> : vector<16xf32>
    %63 = vector.multi_reduction <maximumf>, %62, %cst_22 [1] : vector<16x16xf32> to vector<16xf32>
    %64 = vector.shape_cast %63 : vector<16xf32> to vector<16x1xf32>
    %65 = vector.broadcast %64 : vector<16x1xf32> to vector<16x16xf32>
    %66 = arith.subf %62, %65 : vector<16x16xf32>
    %67 = math.exp %66 : vector<16x16xf32>
    %cst_23 = arith.constant dense<0.000000e+00> : vector<16xf32>
    %68 = vector.multi_reduction <add>, %67, %cst_23 [1] : vector<16x16xf32> to vector<16xf32>
    %69 = vector.shape_cast %68 : vector<16xf32> to vector<16x1xf32>
    %70 = tpu.reciprocal %69 {approx = true} : vector<16x1xf32> -> vector<16x1xf32>
    %71 = vector.broadcast %70 : vector<16x1xf32> to vector<16x16xf32>
    %72 = arith.mulf %67, %71 : vector<16x16xf32>
    %73 = arith.truncf %72 : vector<16x16xf32> to vector<16x16xbf16>
    %74 = arith.truncf %58 : vector<16x8xf32> to vector<16x8xbf16>
    %cst_24 = arith.constant dense<0.000000e+00> : vector<16x8xf32>
    %75 = tpu.matmul %73, %74, %cst_24 {dimension_numbers = #tpu.dot_dimension_numbers<[1], [0], [0], [1], [0, 0, 1, 1], [], []>} : vector<16x16xbf16>, vector<16x8xbf16>, vector<16x8xf32> -> vector<16x8xf32>
    %76 = vector.extract_strided_slice %14 {offsets = [0, 24], sizes = [16, 8], strides = [1, 1]} : vector<16x192xf32> to vector<16x8xf32>
    %77 = vector.extract_strided_slice %14 {offsets = [0, 88], sizes = [16, 8], strides = [1, 1]} : vector<16x192xf32> to vector<16x8xf32>
    %78 = vector.extract_strided_slice %14 {offsets = [0, 152], sizes = [16, 8], strides = [1, 1]} : vector<16x192xf32> to vector<16x8xf32>
    %79 = arith.truncf %76 : vector<16x8xf32> to vector<16x8xbf16>
    %80 = arith.truncf %77 : vector<16x8xf32> to vector<16x8xbf16>
    %cst_25 = arith.constant dense<0.000000e+00> : vector<16x16xf32>
    %81 = tpu.matmul %79, %80, %cst_25 {dimension_numbers = #tpu.dot_dimension_numbers<[1], [1], [0], [0], [0, 0, 1, 0], [], []>} : vector<16x8xbf16>, vector<16x8xbf16>, vector<16x16xf32> -> vector<16x16xf32>
    %82 = arith.addf %81, %15 : vector<16x16xf32>
    %cst_26 = arith.constant dense<0xFF800000> : vector<16xf32>
    %83 = vector.multi_reduction <maximumf>, %82, %cst_26 [1] : vector<16x16xf32> to vector<16xf32>
    %84 = vector.shape_cast %83 : vector<16xf32> to vector<16x1xf32>
    %85 = vector.broadcast %84 : vector<16x1xf32> to vector<16x16xf32>
    %86 = arith.subf %82, %85 : vector<16x16xf32>
    %87 = math.exp %86 : vector<16x16xf32>
    %cst_27 = arith.constant dense<0.000000e+00> : vector<16xf32>
    %88 = vector.multi_reduction <add>, %87, %cst_27 [1] : vector<16x16xf32> to vector<16xf32>
    %89 = vector.shape_cast %88 : vector<16xf32> to vector<16x1xf32>
    %90 = tpu.reciprocal %89 {approx = true} : vector<16x1xf32> -> vector<16x1xf32>
    %91 = vector.broadcast %90 : vector<16x1xf32> to vector<16x16xf32>
    %92 = arith.mulf %87, %91 : vector<16x16xf32>
    %93 = arith.truncf %92 : vector<16x16xf32> to vector<16x16xbf16>
    %94 = arith.truncf %78 : vector<16x8xf32> to vector<16x8xbf16>
    %cst_28 = arith.constant dense<0.000000e+00> : vector<16x8xf32>
    %95 = tpu.matmul %93, %94, %cst_28 {dimension_numbers = #tpu.dot_dimension_numbers<[1], [0], [0], [1], [0, 0, 1, 1], [], []>} : vector<16x16xbf16>, vector<16x8xbf16>, vector<16x8xf32> -> vector<16x8xf32>
    %96 = vector.extract_strided_slice %14 {offsets = [0, 32], sizes = [16, 8], strides = [1, 1]} : vector<16x192xf32> to vector<16x8xf32>
    %97 = vector.extract_strided_slice %14 {offsets = [0, 96], sizes = [16, 8], strides = [1, 1]} : vector<16x192xf32> to vector<16x8xf32>
    %98 = vector.extract_strided_slice %14 {offsets = [0, 160], sizes = [16, 8], strides = [1, 1]} : vector<16x192xf32> to vector<16x8xf32>
    %99 = arith.truncf %96 : vector<16x8xf32> to vector<16x8xbf16>
    %100 = arith.truncf %97 : vector<16x8xf32> to vector<16x8xbf16>
    %cst_29 = arith.constant dense<0.000000e+00> : vector<16x16xf32>
    %101 = tpu.matmul %99, %100, %cst_29 {dimension_numbers = #tpu.dot_dimension_numbers<[1], [1], [0], [0], [0, 0, 1, 0], [], []>} : vector<16x8xbf16>, vector<16x8xbf16>, vector<16x16xf32> -> vector<16x16xf32>
    %102 = arith.addf %101, %15 : vector<16x16xf32>
    %cst_30 = arith.constant dense<0xFF800000> : vector<16xf32>
    %103 = vector.multi_reduction <maximumf>, %102, %cst_30 [1] : vector<16x16xf32> to vector<16xf32>
    %104 = vector.shape_cast %103 : vector<16xf32> to vector<16x1xf32>
    %105 = vector.broadcast %104 : vector<16x1xf32> to vector<16x16xf32>
    %106 = arith.subf %102, %105 : vector<16x16xf32>
    %107 = math.exp %106 : vector<16x16xf32>
    %cst_31 = arith.constant dense<0.000000e+00> : vector<16xf32>
    %108 = vector.multi_reduction <add>, %107, %cst_31 [1] : vector<16x16xf32> to vector<16xf32>
    %109 = vector.shape_cast %108 : vector<16xf32> to vector<16x1xf32>
    %110 = tpu.reciprocal %109 {approx = true} : vector<16x1xf32> -> vector<16x1xf32>
    %111 = vector.broadcast %110 : vector<16x1xf32> to vector<16x16xf32>
    %112 = arith.mulf %107, %111 : vector<16x16xf32>
    %113 = arith.truncf %112 : vector<16x16xf32> to vector<16x16xbf16>
    %114 = arith.truncf %98 : vector<16x8xf32> to vector<16x8xbf16>
    %cst_32 = arith.constant dense<0.000000e+00> : vector<16x8xf32>
    %115 = tpu.matmul %113, %114, %cst_32 {dimension_numbers = #tpu.dot_dimension_numbers<[1], [0], [0], [1], [0, 0, 1, 1], [], []>} : vector<16x16xbf16>, vector<16x8xbf16>, vector<16x8xf32> -> vector<16x8xf32>
    %116 = vector.extract_strided_slice %14 {offsets = [0, 40], sizes = [16, 8], strides = [1, 1]} : vector<16x192xf32> to vector<16x8xf32>
    %117 = vector.extract_strided_slice %14 {offsets = [0, 104], sizes = [16, 8], strides = [1, 1]} : vector<16x192xf32> to vector<16x8xf32>
    %118 = vector.extract_strided_slice %14 {offsets = [0, 168], sizes = [16, 8], strides = [1, 1]} : vector<16x192xf32> to vector<16x8xf32>
    %119 = arith.truncf %116 : vector<16x8xf32> to vector<16x8xbf16>
    %120 = arith.truncf %117 : vector<16x8xf32> to vector<16x8xbf16>
    %cst_33 = arith.constant dense<0.000000e+00> : vector<16x16xf32>
    %121 = tpu.matmul %119, %120, %cst_33 {dimension_numbers = #tpu.dot_dimension_numbers<[1], [1], [0], [0], [0, 0, 1, 0], [], []>} : vector<16x8xbf16>, vector<16x8xbf16>, vector<16x16xf32> -> vector<16x16xf32>
    %122 = arith.addf %121, %15 : vector<16x16xf32>
    %cst_34 = arith.constant dense<0xFF800000> : vector<16xf32>
    %123 = vector.multi_reduction <maximumf>, %122, %cst_34 [1] : vector<16x16xf32> to vector<16xf32>
    %124 = vector.shape_cast %123 : vector<16xf32> to vector<16x1xf32>
    %125 = vector.broadcast %124 : vector<16x1xf32> to vector<16x16xf32>
    %126 = arith.subf %122, %125 : vector<16x16xf32>
    %127 = math.exp %126 : vector<16x16xf32>
    %cst_35 = arith.constant dense<0.000000e+00> : vector<16xf32>
    %128 = vector.multi_reduction <add>, %127, %cst_35 [1] : vector<16x16xf32> to vector<16xf32>
    %129 = vector.shape_cast %128 : vector<16xf32> to vector<16x1xf32>
    %130 = tpu.reciprocal %129 {approx = true} : vector<16x1xf32> -> vector<16x1xf32>
    %131 = vector.broadcast %130 : vector<16x1xf32> to vector<16x16xf32>
    %132 = arith.mulf %127, %131 : vector<16x16xf32>
    %133 = arith.truncf %132 : vector<16x16xf32> to vector<16x16xbf16>
    %134 = arith.truncf %118 : vector<16x8xf32> to vector<16x8xbf16>
    %cst_36 = arith.constant dense<0.000000e+00> : vector<16x8xf32>
    %135 = tpu.matmul %133, %134, %cst_36 {dimension_numbers = #tpu.dot_dimension_numbers<[1], [0], [0], [1], [0, 0, 1, 1], [], []>} : vector<16x16xbf16>, vector<16x8xbf16>, vector<16x8xf32> -> vector<16x8xf32>
    %136 = vector.extract_strided_slice %14 {offsets = [0, 48], sizes = [16, 8], strides = [1, 1]} : vector<16x192xf32> to vector<16x8xf32>
    %137 = vector.extract_strided_slice %14 {offsets = [0, 112], sizes = [16, 8], strides = [1, 1]} : vector<16x192xf32> to vector<16x8xf32>
    %138 = vector.extract_strided_slice %14 {offsets = [0, 176], sizes = [16, 8], strides = [1, 1]} : vector<16x192xf32> to vector<16x8xf32>
    %139 = arith.truncf %136 : vector<16x8xf32> to vector<16x8xbf16>
    %140 = arith.truncf %137 : vector<16x8xf32> to vector<16x8xbf16>
    %cst_37 = arith.constant dense<0.000000e+00> : vector<16x16xf32>
    %141 = tpu.matmul %139, %140, %cst_37 {dimension_numbers = #tpu.dot_dimension_numbers<[1], [1], [0], [0], [0, 0, 1, 0], [], []>} : vector<16x8xbf16>, vector<16x8xbf16>, vector<16x16xf32> -> vector<16x16xf32>
    %142 = arith.addf %141, %15 : vector<16x16xf32>
    %cst_38 = arith.constant dense<0xFF800000> : vector<16xf32>
    %143 = vector.multi_reduction <maximumf>, %142, %cst_38 [1] : vector<16x16xf32> to vector<16xf32>
    %144 = vector.shape_cast %143 : vector<16xf32> to vector<16x1xf32>
    %145 = vector.broadcast %144 : vector<16x1xf32> to vector<16x16xf32>
    %146 = arith.subf %142, %145 : vector<16x16xf32>
    %147 = math.exp %146 : vector<16x16xf32>
    %cst_39 = arith.constant dense<0.000000e+00> : vector<16xf32>
    %148 = vector.multi_reduction <add>, %147, %cst_39 [1] : vector<16x16xf32> to vector<16xf32>
    %149 = vector.shape_cast %148 : vector<16xf32> to vector<16x1xf32>
    %150 = tpu.reciprocal %149 {approx = true} : vector<16x1xf32> -> vector<16x1xf32>
    %151 = vector.broadcast %150 : vector<16x1xf32> to vector<16x16xf32>
    %152 = arith.mulf %147, %151 : vector<16x16xf32>
    %153 = arith.truncf %152 : vector<16x16xf32> to vector<16x16xbf16>
    %154 = arith.truncf %138 : vector<16x8xf32> to vector<16x8xbf16>
    %cst_40 = arith.constant dense<0.000000e+00> : vector<16x8xf32>
    %155 = tpu.matmul %153, %154, %cst_40 {dimension_numbers = #tpu.dot_dimension_numbers<[1], [0], [0], [1], [0, 0, 1, 1], [], []>} : vector<16x16xbf16>, vector<16x8xbf16>, vector<16x8xf32> -> vector<16x8xf32>
    %156 = vector.extract_strided_slice %14 {offsets = [0, 56], sizes = [16, 8], strides = [1, 1]} : vector<16x192xf32> to vector<16x8xf32>
    %157 = vector.extract_strided_slice %14 {offsets = [0, 120], sizes = [16, 8], strides = [1, 1]} : vector<16x192xf32> to vector<16x8xf32>
    %158 = vector.extract_strided_slice %14 {offsets = [0, 184], sizes = [16, 8], strides = [1, 1]} : vector<16x192xf32> to vector<16x8xf32>
    %159 = arith.truncf %156 : vector<16x8xf32> to vector<16x8xbf16>
    %160 = arith.truncf %157 : vector<16x8xf32> to vector<16x8xbf16>
    %cst_41 = arith.constant dense<0.000000e+00> : vector<16x16xf32>
    %161 = tpu.matmul %159, %160, %cst_41 {dimension_numbers = #tpu.dot_dimension_numbers<[1], [1], [0], [0], [0, 0, 1, 0], [], []>} : vector<16x8xbf16>, vector<16x8xbf16>, vector<16x16xf32> -> vector<16x16xf32>
    %162 = arith.addf %161, %15 : vector<16x16xf32>
    %cst_42 = arith.constant dense<0xFF800000> : vector<16xf32>
    %163 = vector.multi_reduction <maximumf>, %162, %cst_42 [1] : vector<16x16xf32> to vector<16xf32>
    %164 = vector.shape_cast %163 : vector<16xf32> to vector<16x1xf32>
    %165 = vector.broadcast %164 : vector<16x1xf32> to vector<16x16xf32>
    %166 = arith.subf %162, %165 : vector<16x16xf32>
    %167 = math.exp %166 : vector<16x16xf32>
    %cst_43 = arith.constant dense<0.000000e+00> : vector<16xf32>
    %168 = vector.multi_reduction <add>, %167, %cst_43 [1] : vector<16x16xf32> to vector<16xf32>
    %169 = vector.shape_cast %168 : vector<16xf32> to vector<16x1xf32>
    %170 = tpu.reciprocal %169 {approx = true} : vector<16x1xf32> -> vector<16x1xf32>
    %171 = vector.broadcast %170 : vector<16x1xf32> to vector<16x16xf32>
    %172 = arith.mulf %167, %171 : vector<16x16xf32>
    %173 = arith.truncf %172 : vector<16x16xf32> to vector<16x16xbf16>
    %174 = arith.truncf %158 : vector<16x8xf32> to vector<16x8xbf16>
    %cst_44 = arith.constant dense<0.000000e+00> : vector<16x8xf32>
    %175 = tpu.matmul %173, %174, %cst_44 {dimension_numbers = #tpu.dot_dimension_numbers<[1], [0], [0], [1], [0, 0, 1, 1], [], []>} : vector<16x16xbf16>, vector<16x8xbf16>, vector<16x8xf32> -> vector<16x8xf32>
    %176 = tpu.concatenate %35, %55, %75, %95, %115, %135, %155, %175 in 1 : vector<16x8xf32>, vector<16x8xf32>, vector<16x8xf32>, vector<16x8xf32>, vector<16x8xf32>, vector<16x8xf32>, vector<16x8xf32>, vector<16x8xf32> -> vector<16x64xf32>
    %177 = arith.truncf %176 : vector<16x64xf32> to vector<16x64xbf16>
    %c32 = arith.constant 32 : index
    %c0_45 = arith.constant 0 : index
    %178 = vector.load %arg3[%c32, %c0_45] : memref<736x128xbf16, #tpu.memory_space<vmem>>, vector<64x128xbf16>
    %cst_46 = arith.constant dense<0.000000e+00> : vector<16x128xf32>
    %179 = tpu.matmul %177, %178, %cst_46 {dimension_numbers = #tpu.dot_dimension_numbers<[1], [0], [0], [1], [0, 0, 1, 1], [], []>} : vector<16x64xbf16>, vector<64x128xbf16>, vector<16x128xf32> -> vector<16x128xf32>
    %c2 = arith.constant 2 : index
    %c0_47 = arith.constant 0 : index
    %180 = vector.load %arg5[%c2, %c0_47] : memref<8x192xf32, #tpu.memory_space<vmem>>, vector<1x128xf32>
    %181 = vector.broadcast %180 : vector<1x128xf32> to vector<16x128xf32>
    %182 = arith.addf %179, %181 : vector<16x128xf32>
    %183 = arith.truncf %182 : vector<16x128xf32> to vector<16x128xbf16>
    %c96 = arith.constant 96 : index
    %c0_48 = arith.constant 0 : index
    %184 = vector.load %arg3[%c96, %c0_48] : memref<736x128xbf16, #tpu.memory_space<vmem>>, vector<128x128xbf16>
    %cst_49 = arith.constant dense<0.000000e+00> : vector<16x128xf32>
    %185 = tpu.matmul %183, %184, %cst_49 {dimension_numbers = #tpu.dot_dimension_numbers<[1], [0], [0], [1], [0, 0, 1, 1], [], []>} : vector<16x128xbf16>, vector<128x128xbf16>, vector<16x128xf32> -> vector<16x128xf32>
    %c3 = arith.constant 3 : index
    %c0_50 = arith.constant 0 : index
    %186 = vector.load %arg5[%c3, %c0_50] : memref<8x192xf32, #tpu.memory_space<vmem>>, vector<1x128xf32>
    %187 = vector.broadcast %186 : vector<1x128xf32> to vector<16x128xf32>
    %188 = arith.addf %185, %187 : vector<16x128xf32>
    %cst_51 = arith.constant 0.000000e+00 : f32
    %189 = vector.broadcast %cst_51 : f32 to vector<16x128xf32>
    %190 = arith.cmpf ogt, %188, %189 : vector<16x128xf32>
    %cst_52 = arith.constant 0.000000e+00 : f32
    %191 = vector.broadcast %cst_52 : f32 to vector<16x128xf32>
    %192 = arith.minimumf %188, %191 : vector<16x128xf32>
    %193 = math.exp %192 : vector<16x128xf32>
    %cst_53 = arith.constant 1.000000e+00 : f32
    %194 = vector.broadcast %cst_53 : f32 to vector<16x128xf32>
    %195 = arith.subf %193, %194 : vector<16x128xf32>
    %196 = arith.select %190, %188, %195 : vector<16x128xi1>, vector<16x128xf32>
    %197 = arith.truncf %196 : vector<16x128xf32> to vector<16x128xbf16>
    %c224 = arith.constant 224 : index
    %c0_54 = arith.constant 0 : index
    %198 = vector.load %arg3[%c224, %c0_54] : memref<736x128xbf16, #tpu.memory_space<vmem>>, vector<128x128xbf16>
    %cst_55 = arith.constant dense<0.000000e+00> : vector<16x128xf32>
    %199 = tpu.matmul %197, %198, %cst_55 {dimension_numbers = #tpu.dot_dimension_numbers<[1], [0], [0], [1], [0, 0, 1, 1], [], []>} : vector<16x128xbf16>, vector<128x128xbf16>, vector<16x128xf32> -> vector<16x128xf32>
    %c4 = arith.constant 4 : index
    %c0_56 = arith.constant 0 : index
    %200 = vector.load %arg5[%c4, %c0_56] : memref<8x192xf32, #tpu.memory_space<vmem>>, vector<1x128xf32>
    %201 = vector.broadcast %200 : vector<1x128xf32> to vector<16x128xf32>
    %202 = arith.addf %199, %201 : vector<16x128xf32>
    %cst_57 = arith.constant 0.000000e+00 : f32
    %203 = vector.broadcast %cst_57 : f32 to vector<16x128xf32>
    %204 = arith.cmpf ogt, %202, %203 : vector<16x128xf32>
    %cst_58 = arith.constant 0.000000e+00 : f32
    %205 = vector.broadcast %cst_58 : f32 to vector<16x128xf32>
    %206 = arith.minimumf %202, %205 : vector<16x128xf32>
    %207 = math.exp %206 : vector<16x128xf32>
    %cst_59 = arith.constant 1.000000e+00 : f32
    %208 = vector.broadcast %cst_59 : f32 to vector<16x128xf32>
    %209 = arith.subf %207, %208 : vector<16x128xf32>
    %210 = arith.select %204, %202, %209 : vector<16x128xi1>, vector<16x128xf32>
    %211 = arith.truncf %210 : vector<16x128xf32> to vector<16x128xbf16>
    %c352 = arith.constant 352 : index
    %c0_60 = arith.constant 0 : index
    %212 = vector.load %arg3[%c352, %c0_60] : memref<736x128xbf16, #tpu.memory_space<vmem>>, vector<128x128xbf16>
    %cst_61 = arith.constant dense<0.000000e+00> : vector<16x128xf32>
    %213 = tpu.matmul %211, %212, %cst_61 {dimension_numbers = #tpu.dot_dimension_numbers<[1], [0], [0], [1], [0, 0, 1, 1], [], []>} : vector<16x128xbf16>, vector<128x128xbf16>, vector<16x128xf32> -> vector<16x128xf32>
    %c5 = arith.constant 5 : index
    %c0_62 = arith.constant 0 : index
    %214 = vector.load %arg5[%c5, %c0_62] : memref<8x192xf32, #tpu.memory_space<vmem>>, vector<1x128xf32>
    %215 = vector.broadcast %214 : vector<1x128xf32> to vector<16x128xf32>
    %216 = arith.addf %213, %215 : vector<16x128xf32>
    %cst_63 = arith.constant 0.000000e+00 : f32
    %217 = vector.broadcast %cst_63 : f32 to vector<16x128xf32>
    %218 = arith.cmpf ogt, %216, %217 : vector<16x128xf32>
    %cst_64 = arith.constant 0.000000e+00 : f32
    %219 = vector.broadcast %cst_64 : f32 to vector<16x128xf32>
    %220 = arith.minimumf %216, %219 : vector<16x128xf32>
    %221 = math.exp %220 : vector<16x128xf32>
    %cst_65 = arith.constant 1.000000e+00 : f32
    %222 = vector.broadcast %cst_65 : f32 to vector<16x128xf32>
    %223 = arith.subf %221, %222 : vector<16x128xf32>
    %224 = arith.select %218, %216, %223 : vector<16x128xi1>, vector<16x128xf32>
    %225 = arith.truncf %224 : vector<16x128xf32> to vector<16x128xbf16>
    %c480 = arith.constant 480 : index
    %c0_66 = arith.constant 0 : index
    %226 = vector.load %arg3[%c480, %c0_66] : memref<736x128xbf16, #tpu.memory_space<vmem>>, vector<128x128xbf16>
    %cst_67 = arith.constant dense<0.000000e+00> : vector<16x128xf32>
    %227 = tpu.matmul %225, %226, %cst_67 {dimension_numbers = #tpu.dot_dimension_numbers<[1], [0], [0], [1], [0, 0, 1, 1], [], []>} : vector<16x128xbf16>, vector<128x128xbf16>, vector<16x128xf32> -> vector<16x128xf32>
    %c6 = arith.constant 6 : index
    %c0_68 = arith.constant 0 : index
    %228 = vector.load %arg5[%c6, %c0_68] : memref<8x192xf32, #tpu.memory_space<vmem>>, vector<1x128xf32>
    %229 = vector.broadcast %228 : vector<1x128xf32> to vector<16x128xf32>
    %230 = arith.addf %227, %229 : vector<16x128xf32>
    %231 = arith.addf %230, %8 : vector<16x128xf32>
    %232 = arith.truncf %231 : vector<16x128xf32> to vector<16x128xbf16>
    %c608 = arith.constant 608 : index
    %c0_69 = arith.constant 0 : index
    %233 = vector.load %arg3[%c608, %c0_69] : memref<736x128xbf16, #tpu.memory_space<vmem>>, vector<128x128xbf16>
    %cst_70 = arith.constant dense<0.000000e+00> : vector<16x128xf32>
    %234 = tpu.matmul %232, %233, %cst_70 {dimension_numbers = #tpu.dot_dimension_numbers<[1], [0], [0], [1], [0, 0, 1, 1], [], []>} : vector<16x128xbf16>, vector<128x128xbf16>, vector<16x128xf32> -> vector<16x128xf32>
    %c7 = arith.constant 7 : index
    %c0_71 = arith.constant 0 : index
    %235 = vector.load %arg5[%c7, %c0_71] : memref<8x192xf32, #tpu.memory_space<vmem>>, vector<1x128xf32>
    %236 = vector.broadcast %235 : vector<1x128xf32> to vector<16x128xf32>
    %237 = arith.addf %234, %236 : vector<16x128xf32>
    %c0_72 = arith.constant 0 : index
    %c0_73 = arith.constant 0 : index
    %238 = vector.load %arg6[%c0_72, %c0_73] : memref<16x128xf32, #tpu.memory_space<vmem>>, vector<16x128xf32>
    tpu.vector_store %arg6[%c0_72, %c0_73], %237 {strides = array<i32>} : memref<16x128xf32, #tpu.memory_space<vmem>>, vector<16x128xf32>,
    return
  }
}

</mosaic_0001>

<bundles_post_ra>
// kernel: mdlm_head_forward.1
= control target key start
LH: loop header
LB: loop body
LE: loop exit
PB: predicated region body
PF: predicated region fallthrough
CT: control target
= control target key end

     0   :  { %11 = vsyncpa [#allocation3], 0  ;;  %s2577_s21 = smov [#allocation2]   ;;  %s3110_s0 = inlined_call_operand.vmem [shape: f32[16,32], index: 0, kind: input, shape index: {}]   ;;  %s3111_s1 = inlined_call_operand.vmem [shape: f32[16,128], index: 1, kind: input, shape index: {}]   ;;  %s3112_s2 = inlined_call_operand.vmem [shape: f32[16,16], index: 2, kind: input, shape index: {}]   ;;  %s3113_s3 = inlined_call_operand.hbm [shape: bf16[736,128], index: 3, kind: input, shape index: {}]   ;;  %s3114_s4 = inlined_call_operand.vmem [shape: bf16[128,192], index: 4, kind: input, shape index: {}]   ;;  %s3115_s5 = inlined_call_operand.vmem [shape: f32[8,192], index: 5, kind: input, shape index: {}]   ;;  %s3116_s6 = inlined_call_operand.vmem [shape: f32[16,128], index: 6, kind: output, shape index: {}]  }
   0x1   :  { %s23_s22 = sshll.u32 %s2577_s21, 4  ;;  %s2553_s25 = scalar_lea.hbm %s3113_s3, 5888  ;;  %s24_s22 = int_to_ptr.vmem [resolvable:$true] %s23_s22 }
   0x2   :  { %p2554_p0 = scmp.ne.s32.totalorder %s3113_s3, %s2553_s25  ;;  %p2557_p1 = scmp.lt.u32.totalorder %s2553_s25, %s3113_s3 }
   0x4   :  { %p2559_p2 = pnand %p2557_p1, %p2554_p0 }
   0x6   :  { %2562 = shalt.err (!%p2559_p2)
}
   0x7   :  { %s2563_s30 = scalar_lea.vmem %s24_s22, 5888  ;;  %p2568_p4 = scmp.lt.s32.totalorder %s24_s22, %s24_s22 }
   0x8   :  { %p2564_p3 = scmp.ne.s32.totalorder %s24_s22, %s2563_s30  ;;  %p2569_p5 = scmp.lt.s32.totalorder %s2563_s30, %s2563_s30 }
   0xa   :  { %p2570_p6 = por %p2569_p5, %p2568_p4 }
   0xc   :  { %p2571_p7 = pnand %p2570_p6, %p2564_p3 }
   0xe   :  { %2574 = shalt.err (!%p2571_p7)
}
   0xf   :  { %s2578_s7 = smov 64   ;;  %s2579_s8 = smov 4  }
  0x10   :  { %29 = dma.hbm_to_vmem [thread:$0]  %s3113_s3, 5888, %s24_s22, [#allocation3], %s2578_s7, %s2578_s7, %s2579_s8  }
  0x11   :  { %2575 = dma.done.wait [#allocation3], 5888  }
  0x12   :  { %2576 = vsyncadd [#allocation3], 4294961408  ;;  %v2580_v0 = vmov 0.0   ;;  %vm2581_vm0 = vmmov 0   ;;  %v2407_v1 = vld [vmem:[#allocation2] sm:$0xff]   ;;  %v2408_v2 = vld [vmem:[#allocation2 + $0x8] sm:$0xff]   ;;  %v127_v35 = vlaneseq }
  0x13   :  { %2136 = vmatprep.subr.bf16.mxu1 %v2580_v0  ;;  %2140 = vmatprep.mubr.msk.bf16.mxu1 %vm2581_vm0, %v2580_v0  ;;  %v38_v3 = vld [vmem:[%s3110_s0] sm:$0xff]  ;;  %v39_v4 = vld [vmem:[%s3110_s0 + $0x8] sm:$0xff]  ;;  %vm58_vm1 = vcmask 261120   ;;  %v2414_v8 = vld [vmem:[%s3114_s4 + $0x14] ss:$8 sps:$4 sm:$0xff]   ;;  %v2582_v22 = vmov 0  }
  0x14   :  { %2144 = vmatprep.subr.bf16.mxu0 %v2580_v0  ;;  %2146 = vmatprep.mubr.msk.bf16.mxu0 %vm2581_vm0, %v2580_v0  ;;  %v2411_v5 = vld [vmem:[%s3114_s4 + $0x4] ss:$8 sps:$4 sm:$0xff]   ;;  %v40_v6 = vpack.c.bf16 %v39_v4, %v38_v3  ;;  %v2409_v7 = vld [vmem:[%s3114_s4] ss:$8 sps:$4 sm:$0xff]   ;;  %v2412_v9 = vld [vmem:[%s3114_s4 + $0x10] ss:$8 sps:$4 sm:$0xff]  }
  0x15   :  { %2137 = vmatpush3.bf16.msra.mxu1 %v2407_v1  ;;  %v2417_v10 = vld [vmem:[%s3114_s4 + $0x24] ss:$8 sps:$4 sm:$0xff]   ;;  %v2415_v11 = vld [vmem:[%s3114_s4 + $0x20] ss:$8 sps:$4 sm:$0xff]   ;;  %v2420_v12 = vld [vmem:[%s3114_s4 + $0x34] ss:$8 sps:$4 sm:$0xff]  }
  0x16   :  { %2138 = vmatprep.subr.bf16.mxu1 %v2580_v0  ;;  %v2418_v13 = vld [vmem:[%s3114_s4 + $0x30] ss:$8 sps:$4 sm:$0xff]   ;;  %v2423_v14 = vld [vmem:[%s3114_s4 + $0x44] ss:$8 sps:$4 sm:$0xff]   ;;  %v2421_v15 = vld [vmem:[%s3114_s4 + $0x40] ss:$8 sps:$4 sm:$0xff]  }
  0x17   :  { %v2426_v16 = vld [vmem:[%s3114_s4 + $0x54] ss:$8 sps:$4 sm:$0xff]   ;;  %v2424_v17 = vld [vmem:[%s3114_s4 + $0x50] ss:$8 sps:$4 sm:$0xff]   ;;  %v2429_v18 = vld [vmem:[%s3114_s4 + $0x64] ss:$8 sps:$4 sm:$0xff]  }
  0x18   :  { %v2427_v19 = vld [vmem:[%s3114_s4 + $0x60] ss:$8 sps:$4 sm:$0xff]   ;;  %v2432_v20 = vld [vmem:[%s3114_s4 + $0x74] ss:$8 sps:$4 sm:$0xff]   ;;  %v2430_v21 = vld [vmem:[%s3114_s4 + $0x70] ss:$8 sps:$4 sm:$0xff]  }
  0x19   :  { %2139 = vmatpush3.bf16.msra.mxu1 %v2408_v2  ;;  %v45_v23 = vld [vmem:[%s3115_s5] ss:$0 sm:$0xff]  ;;  %v104_v29 = vld [vmem:[%s3111_s1 + $0x8] sm:$0xff]  ;;  %v128_v36 = vshrl.u32 %v127_v35, 7  ;;  %vm266_vm2 = vcmask 64512   ;;  %vm314_vm3 = vcmask 130048  }
  0x1a   :  { %217 = vmatprep.subr.bf16.mxu1 %v2411_v5  ;;  %v103_v27 = vld [vmem:[%s3111_s1] sm:$0xff]  ;;  %v2751_v56 = vld [vmem:[%s3112_s2 + $0x8] sm:$0xff]  ;;  %s2583_s29 = smov 56   ;;  %s2585_s30 = smov 88   ;;  %vm1291_vm4 = vcmask 195584   ;;  %vm1296_vm5 = vcmask 326656  }
  0x1b   :  { %v129_v37 = vsub.s32 0, %v128_v36  ;;  %v1967_v38 = vld [vmem:[%s3115_s5 + $0x1] ss:$8 sm:$0x3]  ;;  %v133_v39 = vsub.s32 1, %v128_v36  ;;  %s2586_s8 = smov 80  }
  0x1c   :  { %2141 = vmatmul.mubr.msk.bf16.vlgmr.msra.gmra.mrb[0].mxu1 %vm58_vm1, %v40_v6  ;;  %v2746_v54 = vld [vmem:[%s3112_s2] sm:$0xff]  ;;  %s2584_s2 = smov 112   ;;  %s2587_s9 = smov 72   ;;  %vm1299_vm6 = vcmask 392192   ;;  %vm1302_vm7 = vcmask 457728   ;;  %vm1339_vm8 = vcmask 523264  }
  0x1d   :  { %218 = vmatpush1.bf16.msra.mxu1 %v2409_v7  ;;  %249 = vmatprep.mubr.bf16.mxu1 %v2582_v22  ;;  %v130_v40 = vrot.slane %v1967_v38, %v129_v37  ;;  %v134_v42 = vrot.slane %v1967_v38, %v133_v39  ;;  %s2588_s10 = smov 120   ;;  %s2589_s11 = smov 48  }
  0x1e   :  { %219 = vmatprep.subr.bf16.mxu1 %v2414_v8  ;;  %s2590_s12 = smov 40   ;;  %s2591_s3 = smov 104  }
  0x1f   :  { %s2592_s13 = smov 32   ;;  %s2593_s14 = smov 96  }
  0x20   :  { %s2594_s15 = smov 24   ;;  %s2595_s16 = smov 16  }
  0x21   :  { %220 = vmatpush1.bf16.msra.mxu1 %v2412_v9  ;;  %s2596_s17 = smov 8  }
  0x22   :  { %221 = vmatprep.subr.bf16.mxu1 %v2417_v10 }
  0x25   :  { %222 = vmatpush1.bf16.msra.mxu1 %v2415_v11 }
  0x26   :  { %223 = vmatprep.subr.bf16.mxu1 %v2420_v12 }
  0x29   :  { %224 = vmatpush1.bf16.msra.mxu1 %v2418_v13 }
  0x2a   :  { %225 = vmatprep.subr.bf16.mxu1 %v2423_v14 }
  0x2d   :  { %226 = vmatpush1.bf16.msra.mxu1 %v2421_v15 }
  0x2e   :  { %227 = vmatprep.subr.bf16.mxu1 %v2426_v16 }
  0x31   :  { %228 = vmatpush1.bf16.msra.mxu1 %v2424_v17 }
  0x32   :  { %229 = vmatprep.subr.bf16.mxu1 %v2429_v18 }
  0x35   :  { %230 = vmatpush1.bf16.msra.mxu1 %v2427_v19 }
  0x36   :  { %231 = vmatprep.subr.bf16.mxu1 %v2432_v20 }
  0x39   :  { %232 = vmatpush1.bf16.msra.mxu1 %v2430_v21 }
  0x3a   :  { %2168 = vmatprep.subr.bf16.mxu1 %v2580_v0 }
  0xef   :  { %v96_v24 = vpop.f32.mrb[0].mxu1 }
  0xf0   :  { %v97_v25 = vadd.f32 %v96_v24, %v45_v23  ;;  %v2142_v26 = vpop.f32.mrb[1].mxu1 }
  0xf1   :  { %v99_v28 = vpop.f32.mrb[2].mxu1 }
  0xf2   :  { %v100_v30 = vadd.f32 %v99_v28, %v45_v23  ;;  %v2143_v31 = vpop.f32.mrb[3].mxu1  ;;  %v2718_v32 = vadd.f32 %v103_v27, %v97_v25 }
  0xf4   :  { %v2720_v33 = vadd.f32 %v104_v29, %v100_v30 }
  0xf6   :  { %v107_v34 = vpack.c.bf16 %v2720_v33, %v2718_v32 }
  0xf8   :  { %250 = vmatmul.mubr.bf16.vlgmr.msra.gmra.mrb[4].mxu1 %v107_v34 }
  0xf9   :  { %2170 = vmatprep.mubr.msk.bf16.mxu1 %vm2581_vm0, %v2580_v0 }
 0x1cb   :  { %v251_v41 = vpop.f32.mrb[4].mxu1 }
 0x1cc   :  { %v253_v43 = vpop.f32.mrb[5].mxu1  ;;  %v252_v45 = vadd.f32 %v251_v41, %v130_v40 }
 0x1cd   :  { %v255_v44 = vpop.f32.mrb[6].mxu1  ;;  %v254_v48 = vadd.f32 %v253_v43, %v134_v42 }
 0x1ce   :  { %v256_v46 = vadd.f32 %v255_v44, %v130_v40  ;;  %v257_v47 = vpop.f32.mrb[7].mxu1 }
 0x1cf   :  { %v258_v49 = vadd.f32 %v257_v47, %v134_v42 }
 0x1d0   :  { %v2729_v50 = vpack.c.bf16 %v256_v46, %v252_v45 }
 0x1d1   :  { %v2731_v51 = vpack.c.bf16 %v258_v49, %v254_v48 }
 0x1d2   :  { %264 = vrot.lane.b32.xlu0 %v2729_v50, %s2578_s7 }
 0x244   :  { %v265_v52 = vpop.permute.xlu0 %264 }
 0x245   :  { %v271_v53 = vsel %vm266_vm2, %v265_v52, 0 }
 0x246   :  { %2145 = vmatpush3.bf16.xpose.msra.mxu0 %v271_v53 }
 0x247   :  { %2150 = vmatprep.subr.bf16.mxu0 %v2580_v0 }
 0x24d   :  { %2147 = vmatmul.mubr.msk.bf16.vlgmr.msra.gmra.mrb[0].mxu0 %vm266_vm2, %v2729_v50 }
 0x24e   :  { %2151 = vmatpush3.bf16.msra.mxu0 %v2731_v51  ;;  %2152 = vmatprep.mubr.msk.bf16.mxu0 %vm2581_vm0, %v2580_v0 }
 0x24f   :  { %2156 = vmatprep.subr.bf16.mxu0 %v2580_v0 }
 0x320   :  { %v307_v55 = vpop.f32.mrb[0].mxu0 }
 0x321   :  { %v308_v57 = vadd.f32 %v307_v55, %v2746_v54  ;;  %v2148_v58 = vpop.f32.mrb[1].mxu0 }
 0x322   :  { %v310_v59 = vpop.f32.mrb[2].mxu0 }
 0x323   :  { %v311_v60 = vadd.f32 %v310_v59, %v2751_v56  ;;  %v2149_v61 = vpop.f32.mrb[3].mxu0  ;;  %v315_v62 = vsel %vm314_vm3, %v308_v57, -inf }
 0x324   :  { %316 = vmax.xlane.f32.xlu0 %v315_v62 }
 0x325   :  { %v318_v63 = vsel %vm314_vm3, %v311_v60, -inf }
 0x326   :  { %319 = vmax.xlane.f32.xlu1 %v318_v63 }
 0x337   :  { %385 = vrot.lane.b32.xlu1 %v2729_v50, %s2583_s29 }
 0x33a   :  { %505 = vrot.lane.b32.xlu0 %v2729_v50, %s2584_s2 }
 0x33e   :  { %868 = vrot.lane.b32.xlu0 %v2729_v50, %s2585_s30 }
 0x342   :  { %989 = vrot.lane.b32.xlu0 %v2729_v50, %s2586_s8 }
 0x346   :  { %1110 = vrot.lane.b32.xlu0 %v2729_v50, %s2587_s9 }
 0x3b1   :  { %v317_v1 = vpop.xlane.xlu0 %316 }
 0x3b2   :  { %v321_v2 = vsub.f32 %v308_v57, %v317_v1 }
 0x3b3   :  { %v320_v3 = vpop.xlane.xlu1 %319 }
 0x3b4   :  { %v323_v4 = vmul.f32 1.442695, %v321_v2  ;;  %v322_v5 = vsub.f32 %v311_v60, %v320_v3 }
 0x3b5   :  { %v506_v23 = vpop.permute.xlu0 %505 }
 0x3b6   :  { %2477 = vpow2.f32 %v323_v4  ;;  %v325_v6 = vmul.f32 1.442695, %v322_v5 }
 0x3b7   :  { %v386_v11 = vpop.permute.xlu1 %385 }
 0x3b8   :  { %2479 = vpow2.f32 %v325_v6  ;;  %v391_v24 = vsel %vm266_vm2, %v386_v11, 0 }
 0x3b9   :  { %v869_v35 = vpop.permute.xlu0 %868 }
 0x3bd   :  { %v990_v38 = vpop.permute.xlu0 %989 }
 0x3c0   :  { %v2478_v7 = vpop.eup %2477 }
 0x3c1   :  { %v327_v8 = vsel %vm314_vm3, %v2478_v7, 0.0  ;;  %v1111_v40 = vpop.permute.xlu0 %1110 }
 0x3c2   :  { %v2480_v9 = vpop.eup %2479  ;;  %328 = vadd.xlane.f32.xlu1 %v327_v8 }
 0x3c3   :  { %v330_v10 = vsel %vm314_vm3, %v2480_v9, 0.0 }
 0x3c6   :  { %331 = vadd.xlane.f32.xlu1 %v330_v10 }
 0x3d7   :  { %383 = vrot.lane.b32.xlu1 %v2729_v50, %s2588_s10 }
 0x3db   :  { %507 = vrot.lane.b32.xlu1 %v2729_v50, %s2589_s11 }
 0x3df   :  { %628 = vrot.lane.b32.xlu1 %v2729_v50, %s2590_s12 }
 0x3e3   :  { %626 = vrot.lane.b32.xlu1 %v2729_v50, %s2591_s3 }
 0x3e7   :  { %749 = vrot.lane.b32.xlu1 %v2729_v50, %s2592_s13 }
 0x3eb   :  { %747 = vrot.lane.b32.xlu1 %v2729_v50, %s2593_s14 }
 0x3ef   :  { %870 = vrot.lane.b32.xlu1 %v2729_v50, %s2594_s15 }
 0x3f3   :  { %991 = vrot.lane.b32.xlu1 %v2729_v50, %s2595_s16 }
 0x3f7   :  { %1112 = vrot.lane.b32.xlu1 %v2729_v50, %s2596_s17 }
 0x44f   :  { %v329_v12 = vpop.xlane.xlu1 %328 }
 0x450   :  { %2481 = vrcp.f32 %v329_v12 }
 0x453   :  { %v332_v13 = vpop.xlane.xlu1 %331 }
 0x454   :  { %2483 = vrcp.f32 %v332_v13 }
 0x457   :  { %v384_v14 = vpop.permute.xlu1 %383 }
 0x45a   :  { %v2482_v16 = vpop.eup %2481 }
 0x45b   :  { %v508_v15 = vpop.permute.xlu1 %507  ;;  %v335_v19 = vmul.f32 %v2482_v16, %v2478_v7 }
 0x45c   :  { %v513_v17 = vsel %vm266_vm2, %v508_v15, 0 }
 0x45d   :  { %2169 = vmatpush3.bf16.xpose.msra.mxu1 %v513_v17 }
 0x45e   :  { %v2484_v18 = vpop.eup %2483  ;;  %2180 = vmatprep.subr.bf16.mxu1 %v2580_v0 }
 0x45f   :  { %v336_v20 = vmul.f32 %v2484_v18, %v2480_v9  ;;  %v629_v21 = vpop.permute.xlu1 %628 }
 0x460   :  { %v634_v26 = vsel %vm266_vm2, %v629_v21, 0 }
 0x461   :  { %v337_v22 = vpack.c.bf16 %v336_v20, %v335_v19 }
 0x463   :  { %2153 = vmatmul.mubr.msk.bf16.vlgmr.msra.gmra.mrb[4].mxu0 %vm314_vm3, %v337_v22  ;;  %v627_v25 = vpop.permute.xlu1 %626 }
 0x464   :  { %2157 = vmatpush3.bf16.xpose.msra.mxu0 %v391_v24  ;;  %2171 = vmatmul.mubr.msk.bf16.vlgmr.msra.gmra.mrb[8].mxu1 %vm266_vm2, %v506_v23 }
 0x465   :  { %2181 = vmatpush3.bf16.xpose.msra.mxu1 %v634_v26  ;;  %2158 = vmatprep.mubr.msk.bf16.mxu0 %vm2581_vm0, %v2580_v0 }
 0x466   :  { %2182 = vmatprep.mubr.msk.bf16.mxu1 %vm2581_vm0, %v2580_v0  ;;  %2192 = vmatprep.subr.bf16.mxu1 %v2580_v0 }
 0x467   :  { %v750_v27 = vpop.permute.xlu1 %749  ;;  %2162 = vmatprep.subr.bf16.mxu0 %v2580_v0 }
 0x468   :  { %v755_v29 = vsel %vm266_vm2, %v750_v27, 0 }
 0x46b   :  { %2159 = vmatmul.mubr.msk.bf16.vlgmr.msra.gmra.mrb[8].mxu0 %vm266_vm2, %v384_v14  ;;  %v748_v28 = vpop.permute.xlu1 %747 }
 0x46c   :  { %2183 = vmatmul.mubr.msk.bf16.vlgmr.msra.gmra.mrb[12].mxu1 %vm266_vm2, %v627_v25  ;;  %2164 = vmatprep.mubr.msk.bf16.mxu0 %vm2581_vm0, %v2580_v0 }
 0x46d   :  { %2193 = vmatpush3.bf16.xpose.msra.mxu1 %v755_v29  ;;  %2194 = vmatprep.mubr.msk.bf16.mxu1 %vm2581_vm0, %v2580_v0 }
 0x46e   :  { %2204 = vmatprep.subr.bf16.mxu1 %v2580_v0 }
 0x46f   :  { %v871_v30 = vpop.permute.xlu1 %870 }
 0x470   :  { %v876_v31 = vsel %vm266_vm2, %v871_v30, 0 }
 0x473   :  { %v992_v34 = vpop.permute.xlu1 %991 }
 0x474   :  { %2195 = vmatmul.mubr.msk.bf16.vlgmr.msra.gmra.mrb[16].mxu1 %vm266_vm2, %v748_v28  ;;  %v997_v36 = vsel %vm266_vm2, %v992_v34, 0 }
 0x475   :  { %2205 = vmatpush3.bf16.xpose.msra.mxu1 %v876_v31  ;;  %2206 = vmatprep.mubr.msk.bf16.mxu1 %vm2581_vm0, %v2580_v0 }
 0x476   :  { %2216 = vmatprep.subr.bf16.mxu1 %v2580_v0 }
 0x477   :  { %v1113_v37 = vpop.permute.xlu1 %1112 }
 0x478   :  { %v1118_v39 = vsel %vm266_vm2, %v1113_v37, 0 }
 0x47c   :  { %2207 = vmatmul.mubr.msk.bf16.vlgmr.msra.gmra.mrb[20].mxu1 %vm266_vm2, %v869_v35 }
 0x47d   :  { %2217 = vmatpush3.bf16.xpose.msra.mxu1 %v997_v36  ;;  %2218 = vmatprep.mubr.msk.bf16.mxu1 %vm2581_vm0, %v2580_v0 }
 0x47e   :  { %2228 = vmatprep.subr.bf16.mxu1 %v2580_v0 }
 0x484   :  { %2219 = vmatmul.mubr.msk.bf16.vlgmr.msra.gmra.mrb[24].mxu1 %vm266_vm2, %v990_v38 }
 0x485   :  { %2229 = vmatpush3.bf16.xpose.msra.mxu1 %v1118_v39  ;;  %2230 = vmatprep.mubr.msk.bf16.mxu1 %vm2581_vm0, %v2580_v0 }
 0x486   :  { %2240 = vmatprep.subr.bf16.mxu1 %v2580_v0 }
 0x48c   :  { %2231 = vmatmul.mubr.msk.bf16.vlgmr.msra.gmra.mrb[28].mxu1 %vm266_vm2, %v1111_v40 }
 0x48d   :  { %2248 = vmatprep.mubr.msk.bf16.mxu1 %vm2581_vm0, %v2580_v0 }
 0x536   :  { %v2825_v41 = vpop.f32.mrb[4].mxu0 }
 0x537   :  { %v2154_v42 = vpop.f32.mrb[5].mxu0  ;;  %v549_v43 = vpop.f32.mrb[8].mxu1 }
 0x538   :  { %v2827_v44 = vpop.f32.mrb[6].mxu0  ;;  %v2172_v45 = vpop.f32.mrb[9].mxu1  ;;  %v550_v1 = vadd.f32 %v549_v43, %v2746_v54 }
 0x539   :  { %v2155_v46 = vpop.f32.mrb[7].mxu0  ;;  %v552_v47 = vpop.f32.mrb[10].mxu1 }
 0x53a   :  { %v2173_v48 = vpop.f32.mrb[11].mxu1  ;;  %v2833_v58 = vadd.f32 %v552_v47, %v2751_v56  ;;  %v556_v7 = vsel %vm314_vm3, %v550_v1, -inf }
 0x53c   :  { %v559_v4 = vsel %vm314_vm3, %v2833_v58, -inf }
 0x53e   :  { %v427_v49 = vpop.f32.mrb[8].mxu0 }
 0x53f   :  { %v2830_v50 = vadd.f32 %v427_v49, %v2746_v54  ;;  %v2160_v52 = vpop.f32.mrb[9].mxu0  ;;  %v670_v53 = vpop.f32.mrb[12].mxu1 }
 0x540   :  { %v430_v55 = vpop.f32.mrb[10].mxu0  ;;  %v2184_v57 = vpop.f32.mrb[13].mxu1  ;;  %v2849_v5 = vadd.f32 %v670_v53, %v2746_v54 }
 0x541   :  { %v2836_v59 = vadd.f32 %v430_v55, %v2751_v56  ;;  %v2161_v60 = vpop.f32.mrb[11].mxu0  ;;  %v673_v61 = vpop.f32.mrb[14].mxu1  ;;  %v434_v62 = vsel %vm314_vm3, %v2830_v50, -inf }
 0x542   :  { %v2185_v63 = vpop.f32.mrb[15].mxu1  ;;  %435 = vmax.xlane.f32.xlu1 %v434_v62  ;;  %v2844_v3 = vadd.f32 %v673_v61, %v2751_v56  ;;  %v677_v14 = vsel %vm314_vm3, %v2849_v5, -inf }
 0x543   :  { %v437_v2 = vsel %vm314_vm3, %v2836_v59, -inf }
 0x544   :  { %438 = vmax.xlane.f32.xlu0 %v437_v2  ;;  %v680_v10 = vsel %vm314_vm3, %v2844_v3, -inf }
 0x546   :  { %560 = vmax.xlane.f32.xlu1 %v559_v4 }
 0x547   :  { %v791_v6 = vpop.f32.mrb[16].mxu1 }
 0x548   :  { %v2196_v8 = vpop.f32.mrb[17].mxu1  ;;  %557 = vmax.xlane.f32.xlu0 %v556_v7  ;;  %v2856_v13 = vadd.f32 %v791_v6, %v2746_v54 }
 0x549   :  { %v794_v9 = vpop.f32.mrb[18].mxu1 }
 0x54a   :  { %v795_v11 = vadd.f32 %v794_v9, %v2751_v56  ;;  %v2197_v12 = vpop.f32.mrb[19].mxu1  ;;  %681 = vmax.xlane.f32.xlu1 %v680_v10  ;;  %v798_v17 = vsel %vm314_vm3, %v2856_v13, -inf }
 0x54c   :  { %678 = vmax.xlane.f32.xlu0 %v677_v14  ;;  %v801_v15 = vsel %vm314_vm3, %v795_v11, -inf }
 0x54e   :  { %802 = vmax.xlane.f32.xlu1 %v801_v15 }
 0x54f   :  { %v912_v16 = vpop.f32.mrb[20].mxu1 }
 0x550   :  { %v2864_v18 = vadd.f32 %v912_v16, %v2746_v54  ;;  %v2208_v19 = vpop.f32.mrb[21].mxu1  ;;  %799 = vmax.xlane.f32.xlu0 %v798_v17 }
 0x551   :  { %v915_v20 = vpop.f32.mrb[22].mxu1 }
 0x552   :  { %v2867_v21 = vadd.f32 %v915_v20, %v2751_v56  ;;  %v2209_v22 = vpop.f32.mrb[23].mxu1  ;;  %v919_v23 = vsel %vm314_vm3, %v2864_v18, -inf }
 0x554   :  { %920 = vmax.xlane.f32.xlu0 %v919_v23  ;;  %v922_v24 = vsel %vm314_vm3, %v2867_v21, -inf }
 0x555   :  { %923 = vmax.xlane.f32.xlu1 %v922_v24 }
 0x557   :  { %v1033_v25 = vpop.f32.mrb[24].mxu1 }
 0x558   :  { %v2874_v26 = vadd.f32 %v1033_v25, %v2746_v54  ;;  %v2220_v27 = vpop.f32.mrb[25].mxu1 }
 0x559   :  { %v1036_v28 = vpop.f32.mrb[26].mxu1 }
 0x55a   :  { %v2877_v29 = vadd.f32 %v1036_v28, %v2751_v56  ;;  %v2221_v30 = vpop.f32.mrb[27].mxu1  ;;  %v1040_v31 = vsel %vm314_vm3, %v2874_v26, -inf }
 0x55b   :  { %1041 = vmax.xlane.f32.xlu0 %v1040_v31 }
 0x55c   :  { %v1043_v34 = vsel %vm314_vm3, %v2877_v29, -inf }
 0x55d   :  { %1044 = vmax.xlane.f32.xlu1 %v1043_v34 }
 0x55f   :  { %v1154_v35 = vpop.f32.mrb[28].mxu1 }
 0x560   :  { %v2884_v36 = vadd.f32 %v1154_v35, %v2746_v54  ;;  %v2232_v37 = vpop.f32.mrb[29].mxu1 }
 0x561   :  { %v1157_v38 = vpop.f32.mrb[30].mxu1 }
 0x562   :  { %v2887_v39 = vadd.f32 %v1157_v38, %v2751_v56  ;;  %v2233_v40 = vpop.f32.mrb[31].mxu1  ;;  %v1161_v42 = vsel %vm314_vm3, %v2884_v36, -inf }
 0x563   :  { %1162 = vmax.xlane.f32.xlu0 %v1161_v42 }
 0x564   :  { %v1164_v43 = vsel %vm314_vm3, %v2887_v39, -inf }
 0x565   :  { %1165 = vmax.xlane.f32.xlu1 %v1164_v43 }
 0x5cf   :  { %v436_v45 = vpop.xlane.xlu1 %435 }
 0x5d0   :  { %v440_v63 = vsub.f32 %v2830_v50, %v436_v45 }
 0x5d1   :  { %v439_v46 = vpop.xlane.xlu0 %438 }
 0x5d2   :  { %v442_v7 = vmul.f32 1.442695, %v440_v63 }
 0x5d3   :  { %v561_v47 = vpop.xlane.xlu1 %560 }
 0x5d4   :  { %v563_v54 = vsub.f32 %v2833_v58, %v561_v47 }
 0x5d5   :  { %v558_v48 = vpop.xlane.xlu0 %557 }
 0x5d6   :  { %v566_v49 = vmul.f32 1.442695, %v563_v54  ;;  %v562_v52 = vsub.f32 %v550_v1, %v558_v48 }
 0x5d7   :  { %v682_v53 = vpop.xlane.xlu1 %681 }
 0x5d8   :  { %2485 = vpow2.f32 %v566_v49  ;;  %v564_v56 = vmul.f32 1.442695, %v562_v52  ;;  %v684_v55 = vsub.f32 %v2844_v3, %v682_v53 }
 0x5d9   :  { %v679_v57 = vpop.xlane.xlu0 %678 }
 0x5da   :  { %2487 = vpow2.f32 %v564_v56  ;;  %v687_v60 = vmul.f32 1.442695, %v684_v55  ;;  %v683_v61 = vsub.f32 %v2849_v5, %v679_v57 }
 0x5db   :  { %v803_v62 = vpop.xlane.xlu1 %802 }
 0x5dc   :  { %2489 = vpow2.f32 %v687_v60  ;;  %v685_v2 = vmul.f32 1.442695, %v683_v61  ;;  %v805_v4 = vsub.f32 %v795_v11, %v803_v62 }
 0x5dd   :  { %v800_v58 = vpop.xlane.xlu0 %799 }
 0x5de   :  { %2491 = vpow2.f32 %v685_v2  ;;  %v808_v6 = vmul.f32 1.442695, %v805_v4  ;;  %v804_v1 = vsub.f32 %v2856_v13, %v800_v58  ;;  %v441_v13 = vsub.f32 %v2836_v59, %v439_v46 }
 0x5e0   :  { %2493 = vpow2.f32 %v808_v6  ;;  %v806_v8 = vmul.f32 1.442695, %v804_v1  ;;  %v444_v20 = vmul.f32 1.442695, %v441_v13 }
 0x5e1   :  { %v921_v3 = vpop.xlane.xlu0 %920 }
 0x5e2   :  { %v2898_v9 = vpop.eup %2485  ;;  %2495 = vpow2.f32 %v806_v8  ;;  %v925_v5 = vsub.f32 %v2864_v18, %v921_v3  ;;  %v924_v10 = vpop.xlane.xlu1 %923 }
 0x5e3   :  { %v926_v50 = vsub.f32 %v2867_v21, %v924_v10  ;;  %v571_v11 = vsel %vm314_vm3, %v2898_v9, 0.0  ;;  %2497 = vpow2.f32 %v442_v7 }
 0x5e4   :  { %v2904_v12 = vpop.eup %2487  ;;  %v927_v14 = vmul.f32 1.442695, %v925_v5  ;;  %572 = vadd.xlane.f32.xlu1 %v571_v11 }
 0x5e5   :  { %v929_v15 = vmul.f32 1.442695, %v926_v50  ;;  %v568_v16 = vsel %vm314_vm3, %v2904_v12, 0.0 }
 0x5e6   :  { %v2909_v17 = vpop.eup %2489  ;;  %2499 = vpow2.f32 %v927_v14  ;;  %569 = vadd.xlane.f32.xlu0 %v568_v16 }
 0x5e7   :  { %v692_v18 = vsel %vm314_vm3, %v2909_v17, 0.0  ;;  %2501 = vpow2.f32 %v929_v15 }
 0x5e8   :  { %v2913_v19 = vpop.eup %2491  ;;  %693 = vadd.xlane.f32.xlu1 %v692_v18  ;;  %2503 = vpow2.f32 %v444_v20  ;;  %v1042_v38 = vpop.xlane.xlu0 %1041 }
 0x5e9   :  { %v689_v59 = vsel %vm314_vm3, %v2913_v19, 0.0  ;;  %v1046_v40 = vsub.f32 %v2874_v26, %v1042_v38 }
 0x5ea   :  { %v2917_v21 = vpop.eup %2493  ;;  %690 = vadd.xlane.f32.xlu0 %v689_v59  ;;  %v1045_v43 = vpop.xlane.xlu1 %1044 }
 0x5eb   :  { %v813_v22 = vsel %vm314_vm3, %v2917_v21, 0.0  ;;  %v1048_v42 = vmul.f32 1.442695, %v1046_v40  ;;  %v1047_v45 = vsub.f32 %v2877_v29, %v1045_v43 }
 0x5ec   :  { %v2921_v23 = vpop.eup %2495  ;;  %814 = vadd.xlane.f32.xlu1 %v813_v22 }
 0x5ed   :  { %v810_v24 = vsel %vm314_vm3, %v2921_v23, 0.0  ;;  %v2925_v25 = vpop.eup %2497  ;;  %2505 = vpow2.f32 %v1048_v42  ;;  %v1050_v47 = vmul.f32 1.442695, %v1047_v45 }
 0x5ee   :  { %811 = vadd.xlane.f32.xlu0 %v810_v24  ;;  %v446_v28 = vsel %vm314_vm3, %v2925_v25, 0.0 }
 0x5ef   :  { %2507 = vpow2.f32 %v1050_v47 }
 0x5f0   :  { %v2927_v27 = vpop.eup %2499  ;;  %v1163_v46 = vpop.xlane.xlu0 %1162 }
 0x5f1   :  { %v931_v30 = vsel %vm314_vm3, %v2927_v27, 0.0  ;;  %v2933_v31 = vpop.eup %2501  ;;  %v1167_v54 = vsub.f32 %v2884_v36, %v1163_v46 }
 0x5f2   :  { %447 = vadd.xlane.f32.xlu0 %v446_v28  ;;  %932 = vadd.xlane.f32.xlu1 %v931_v30  ;;  %v934_v34 = vsel %vm314_vm3, %v2933_v31, 0.0  ;;  %v2937_v35 = vpop.eup %2503  ;;  %v1166_v48 = vpop.xlane.xlu1 %1165 }
 0x5f3   :  { %v449_v37 = vsel %vm314_vm3, %v2937_v35, 0.0  ;;  %v1169_v49 = vmul.f32 1.442695, %v1167_v54  ;;  %v1168_v52 = vsub.f32 %v2887_v39, %v1166_v48 }
 0x5f5   :  { %2509 = vpow2.f32 %v1169_v49  ;;  %v1171_v56 = vmul.f32 1.442695, %v1168_v52 }
 0x5f6   :  { %935 = vadd.xlane.f32.xlu1 %v934_v34 }
 0x5f7   :  { %v2949_v53 = vpop.eup %2505  ;;  %2511 = vpow2.f32 %v1171_v56 }
 0x5f8   :  { %v1052_v26 = vsel %vm314_vm3, %v2949_v53, 0.0 }
 0x5f9   :  { %v2953_v55 = vpop.eup %2507 }
 0x5fa   :  { %450 = vadd.xlane.f32.xlu1 %v449_v37  ;;  %v1055_v29 = vsel %vm314_vm3, %v2953_v55, 0.0 }
 0x5ff   :  { %v2957_v36 = vpop.eup %2509 }
 0x600   :  { %v1173_v39 = vsel %vm314_vm3, %v2957_v36, 0.0 }
 0x601   :  { %v2961_v57 = vpop.eup %2511 }
 0x602   :  { %v1176_v60 = vsel %vm314_vm3, %v2961_v57, 0.0 }
 0x608   :  { %458 = vrot.lane.b32.xlu0 %v2731_v51, %s2588_s10 }
 0x60b   :  { %579 = vrot.lane.b32.xlu1 %v2731_v51, %s2584_s2 }
 0x627   :  { %1053 = vadd.xlane.f32.xlu0 %v1052_v26 }
 0x62f   :  { %1056 = vadd.xlane.f32.xlu1 %v1055_v29 }
 0x633   :  { %1174 = vadd.xlane.f32.xlu1 %v1173_v39 }
 0x637   :  { %1177 = vadd.xlane.f32.xlu1 %v1176_v60 }
 0x63d   :  { %700 = vrot.lane.b32.xlu0 %v2731_v51, %s2591_s3 }
 0x641   :  { %942 = vrot.lane.b32.xlu0 %v2731_v51, %s2585_s30 }
 0x645   :  { %1063 = vrot.lane.b32.xlu0 %v2731_v51, %s2586_s8 }
 0x648   :  { %821 = vrot.lane.b32.xlu1 %v2731_v51, %s2593_s14 }
 0x649   :  { %1184 = vrot.lane.b32.xlu0 %v2731_v51, %s2587_s9 }
 0x671   :  { %v573_v61 = vpop.xlane.xlu1 %572 }
 0x673   :  { %v570_v62 = vpop.xlane.xlu0 %569 }
 0x675   :  { %v694_v63 = vpop.xlane.xlu1 %693 }
 0x677   :  { %v691_v2 = vpop.xlane.xlu0 %690 }
 0x679   :  { %v815_v4 = vpop.xlane.xlu1 %814 }
 0x67a   :  { %2513 = vrcp.f32 %v815_v4 }
 0x67b   :  { %v812_v58 = vpop.xlane.xlu0 %811 }
 0x67c   :  { %2515 = vrcp.f32 %v812_v58 }
 0x67f   :  { %v933_v6 = vpop.xlane.xlu1 %932  ;;  %v448_v1 = vpop.xlane.xlu0 %447 }
 0x680   :  { %2517 = vrcp.f32 %v933_v6 }
 0x683   :  { %v936_v7 = vpop.xlane.xlu1 %935  ;;  %v459_v8 = vpop.permute.xlu0 %458 }
 0x684   :  { %v2514_v3 = vpop.eup %2513  ;;  %2519 = vrcp.f32 %v936_v7  ;;  %2163 = vmatpush3.bf16.msra.mxu0 %v459_v8 }
 0x685   :  { %2174 = vmatprep.subr.bf16.mxu0 %v2580_v0  ;;  %2521 = vrcp.f32 %v448_v1  ;;  %v819_v51 = vmul.f32 %v2514_v3, %v2917_v21 }
 0x686   :  { %v2516_v5 = vpop.eup %2515 }
 0x687   :  { %v818_v10 = vmul.f32 %v2516_v5, %v2921_v23  ;;  %v451_v50 = vpop.xlane.xlu1 %450 }
 0x688   :  { %2523 = vrcp.f32 %v451_v50 }
 0x689   :  { %v820_v11 = vpack.c.bf16 %v819_v51, %v818_v10  ;;  %2525 = vrcp.f32 %v570_v62 }
 0x68a   :  { %v2518_v13 = vpop.eup %2517  ;;  %2527 = vrcp.f32 %v573_v61 }
 0x68b   :  { %v939_v15 = vmul.f32 %v2518_v13, %v2927_v27  ;;  %v580_v28 = vpop.permute.xlu1 %579  ;;  %2529 = vrcp.f32 %v691_v2 }
 0x68c   :  { %2531 = vrcp.f32 %v694_v63 }
 0x68e   :  { %v2520_v14 = vpop.eup %2519 }
 0x68f   :  { %v940_v16 = vmul.f32 %v2520_v14, %v2933_v31  ;;  %v2522_v18 = vpop.eup %2521 }
 0x690   :  { %v454_v22 = vmul.f32 %v2522_v18, %v2925_v25  ;;  %v2434_v18 = vld [vmem:[#allocation2 + $0x18] sm:$0xff]  }
 0x691   :  { %v941_v20 = vpack.c.bf16 %v940_v16, %v939_v15 }
 0x692   :  { %v2524_v59 = vpop.eup %2523 }
 0x693   :  { %v455_v21 = vmul.f32 %v2524_v59, %v2937_v35  ;;  %v2526_v23 = vpop.eup %2525 }
 0x694   :  { %v2528_v30 = vpop.eup %2527  ;;  %v576_v27 = vmul.f32 %v2526_v23, %v2904_v12 }
 0x695   :  { %v456_v24 = vpack.c.bf16 %v455_v21, %v454_v22  ;;  %v577_v31 = vmul.f32 %v2528_v30, %v2898_v9  ;;  %v2530_v25 = vpop.eup %2529  ;;  %v2435_v21 = vld [vmem:[#allocation2 + $0x20] sm:$0xff]  }
 0x696   :  { %v2532_v37 = vpop.eup %2531  ;;  %v697_v38 = vmul.f32 %v2530_v25, %v2913_v19  ;;  %v2438_v25 = vld [vmem:[#allocation2 + $0x38] sm:$0xff]  }
 0x697   :  { %2165 = vmatmul.mubr.msk.bf16.vlgmr.msra.gmra.mrb[12].mxu0 %vm314_vm3, %v456_v24  ;;  %v578_v34 = vpack.c.bf16 %v577_v31, %v576_v27  ;;  %v698_v40 = vmul.f32 %v2532_v37, %v2909_v17 }
 0x698   :  { %2175 = vmatpush3.bf16.msra.mxu0 %v580_v28  ;;  %2176 = vmatprep.mubr.msk.bf16.mxu0 %vm2581_vm0, %v2580_v0  ;;  %v2436_v28 = vld [vmem:[#allocation2 + $0x28] sm:$0xff]  }
 0x699   :  { %2186 = vmatprep.subr.bf16.mxu0 %v2580_v0  ;;  %v699_v42 = vpack.c.bf16 %v698_v40, %v697_v38 }
 0x69f   :  { %2177 = vmatmul.mubr.msk.bf16.vlgmr.msra.gmra.mrb[16].mxu0 %vm314_vm3, %v578_v34  ;;  %v2437_v34 = vld [vmem:[#allocation2 + $0x30] sm:$0xff]  }
 0x6a0   :  { %2188 = vmatprep.mubr.msk.bf16.mxu0 %vm2581_vm0, %v2580_v0 }
 0x6b4   :  { %v1054_v35 = vpop.xlane.xlu0 %1053 }
 0x6b8   :  { %v701_v12 = vpop.permute.xlu0 %700 }
 0x6b9   :  { %2187 = vmatpush3.bf16.msra.mxu0 %v701_v12 }
 0x6ba   :  { %2198 = vmatprep.subr.bf16.mxu0 %v2580_v0 }
 0x6bc   :  { %v1057_v9 = vpop.xlane.xlu1 %1056  ;;  %2189 = vmatmul.mubr.msk.bf16.vlgmr.msra.gmra.mrb[20].mxu0 %vm314_vm3, %v699_v42  ;;  %v943_v17 = vpop.permute.xlu0 %942  ;;  %v2439_v42 = vld [vmem:[#allocation2 + $0x40] sm:$0xff]  }
 0x6bd   :  { %2200 = vmatprep.mubr.msk.bf16.mxu0 %vm2581_vm0, %v2580_v0  ;;  %2533 = vrcp.f32 %v1057_v9  ;;  %v2440_v9 = vld [vmem:[#allocation2 + $0x48] sm:$0xff]  }
 0x6be   :  { %2535 = vrcp.f32 %v1054_v35 }
 0x6c0   :  { %v1175_v43 = vpop.xlane.xlu1 %1174  ;;  %v1064_v47 = vpop.permute.xlu0 %1063 }
 0x6c4   :  { %v1178_v45 = vpop.xlane.xlu1 %1177  ;;  %v1185_v26 = vpop.permute.xlu0 %1184 }
 0x6c5   :  { %2537 = vrcp.f32 %v1178_v45  ;;  %v2442_v45 = vld [vmem:[#allocation2 + $0x58] sm:$0xff]  }
 0x6c6   :  { %2539 = vrcp.f32 %v1175_v43  ;;  %v2441_v43 = vld [vmem:[#allocation2 + $0x50] sm:$0xff]  }
 0x6c7   :  { %v2534_v19 = vpop.eup %2533 }
 0x6c8   :  { %v822_v46 = vpop.permute.xlu1 %821  ;;  %v2536_v54 = vpop.eup %2535  ;;  %v1061_v48 = vmul.f32 %v2534_v19, %v2953_v55 }
 0x6c9   :  { %2199 = vmatpush3.bf16.msra.mxu0 %v822_v46  ;;  %v1060_v49 = vmul.f32 %v2536_v54, %v2949_v53 }
 0x6ca   :  { %2210 = vmatprep.subr.bf16.mxu0 %v2580_v0 }
 0x6cb   :  { %v1062_v52 = vpack.c.bf16 %v1061_v48, %v1060_v49 }
 0x6cc   :  { %2201 = vmatmul.mubr.msk.bf16.vlgmr.msra.gmra.mrb[24].mxu0 %vm314_vm3, %v820_v11  ;;  %v2433_v11 = vld [vmem:[#allocation2 + $0x10] sm:$0xff]  }
 0x6cd   :  { %2211 = vmatpush3.bf16.msra.mxu0 %v943_v17  ;;  %2212 = vmatprep.mubr.msk.bf16.mxu0 %vm2581_vm0, %v2580_v0 }
 0x6ce   :  { %2222 = vmatprep.subr.bf16.mxu0 %v2580_v0  ;;  %2241 = vmatpush3.bf16.msra.mxu1 %v2433_v11 }
 0x6cf   :  { %v2538_v56 = vpop.eup %2537  ;;  %2242 = vmatprep.subr.bf16.mxu1 %v2580_v0 }
 0x6d0   :  { %v2540_v29 = vpop.eup %2539  ;;  %v1182_v39 = vmul.f32 %v2538_v56, %v2961_v57 }
 0x6d1   :  { %v1181_v55 = vmul.f32 %v2540_v29, %v2957_v36 }
 0x6d2   :  { %2243 = vmatpush3.bf16.msra.mxu1 %v2434_v18  ;;  %v2446_v18 = vld [vmem:[#allocation2 + $0x78] sm:$0xff]  }
 0x6d3   :  { %v1183_v60 = vpack.c.bf16 %v1182_v39, %v1181_v55  ;;  %2244 = vmatprep.subr.bf16.mxu1 %v2580_v0 }
 0x6d4   :  { %2213 = vmatmul.mubr.msk.bf16.vlgmr.msra.gmra.mrb[28].mxu0 %vm314_vm3, %v941_v20 }
 0x6d5   :  { %2223 = vmatpush3.bf16.msra.mxu0 %v1064_v47  ;;  %2224 = vmatprep.mubr.msk.bf16.mxu0 %vm2581_vm0, %v2580_v0 }
 0x6d6   :  { %2234 = vmatprep.subr.bf16.mxu0 %v2580_v0  ;;  %2245 = vmatpush3.bf16.msra.mxu1 %v2435_v21 }
 0x6d7   :  { %2246 = vmatprep.subr.bf16.mxu1 %v2580_v0 }
 0x6da   :  { %2247 = vmatpush3.bf16.msra.mxu1 %v2436_v28 }
 0x6db   :  { %2272 = vmatprep.subr.bf16.mxu1 %v2580_v0 }
 0x6dc   :  { %2225 = vmatmul.mubr.msk.bf16.vlgmr.msra.gmra.mrb[32].mxu0 %vm314_vm3, %v1062_v52 }
 0x6dd   :  { %2235 = vmatpush3.bf16.msra.mxu0 %v1185_v26  ;;  %2236 = vmatprep.mubr.msk.bf16.mxu0 %vm2581_vm0, %v2580_v0 }
 0x6de   :  { %2252 = vmatprep.subr.bf16.mxu0 %v2580_v0 }
 0x6e4   :  { %2237 = vmatmul.mubr.msk.bf16.vlgmr.msra.gmra.mrb[36].mxu0 %vm314_vm3, %v1183_v60 }
 0x6e5   :  { %2268 = vmatprep.mubr.msk.bf16.mxu0 %vm2581_vm0, %v2580_v0  ;;  %2253 = vmatpush3.bf16.msra.mxu0 %v2437_v34  ;;  %v2449_v34 = vld [vmem:[#allocation2 + $0x90] sm:$0xff]  }
 0x6e6   :  { %2254 = vmatprep.subr.bf16.mxu0 %v2580_v0 }
 0x6e9   :  { %2255 = vmatpush3.bf16.msra.mxu0 %v2438_v25  ;;  %v2450_v25 = vld [vmem:[#allocation2 + $0x98] sm:$0xff]  }
 0x6ea   :  { %2256 = vmatprep.subr.bf16.mxu0 %v2580_v0 }
 0x6ed   :  { %2257 = vmatpush3.bf16.msra.mxu0 %v2439_v42 }
 0x6ee   :  { %2258 = vmatprep.subr.bf16.mxu0 %v2580_v0 }
 0x6f1   :  { %2259 = vmatpush3.bf16.msra.mxu0 %v2440_v9 }
 0x6f2   :  { %2260 = vmatprep.subr.bf16.mxu0 %v2580_v0 }
 0x6f5   :  { %2261 = vmatpush3.bf16.msra.mxu0 %v2441_v43 }
 0x6f6   :  { %2262 = vmatprep.subr.bf16.mxu0 %v2580_v0 }
 0x6f9   :  { %2263 = vmatpush3.bf16.msra.mxu0 %v2442_v45 }
 0x6fa   :  { %2264 = vmatprep.subr.bf16.mxu0 %v2580_v0 }
 0x76a   :  { %v498_v53 = vpop.f32.mrb[12].mxu0 }
 0x76b   :  { %v2166_v61 = vpop.f32.mrb[13].mxu0 }
 0x76c   :  { %v501_v62 = vpop.f32.mrb[14].mxu0 }
 0x76d   :  { %v2372_v63 = vpack.i.bf16 %v501_v62, %v498_v53  ;;  %v2167_v2 = vpop.f32.mrb[15].mxu0 }
 0x76f   :  { %2373 = vrot.lane.b32.xlu0 %v2372_v63, %s2596_s17 }
 0x772   :  { %v619_v4 = vpop.f32.mrb[16].mxu0 }
 0x773   :  { %v2178_v58 = vpop.f32.mrb[17].mxu0 }
 0x774   :  { %v622_v57 = vpop.f32.mrb[18].mxu0 }
 0x775   :  { %v2377_v6 = vpack.i.bf16 %v622_v57, %v619_v4  ;;  %v2179_v1 = vpop.f32.mrb[19].mxu0 }
 0x777   :  { %2378 = vrot.lane.b32.xlu1 %v2377_v6, %s2595_s16 }
 0x78f   :  { %v740_v36 = vpop.f32.mrb[20].mxu0 }
 0x790   :  { %v2190_v7 = vpop.f32.mrb[21].mxu0 }
 0x791   :  { %v743_v8 = vpop.f32.mrb[22].mxu0 }
 0x792   :  { %v2382_v3 = vpack.i.bf16 %v743_v8, %v740_v36  ;;  %v2191_v5 = vpop.f32.mrb[23].mxu0 }
 0x794   :  { %2383 = vrot.lane.b32.xlu0 %v2382_v3, %s2594_s15 }
 0x79f   :  { %v861_v51 = vpop.f32.mrb[24].mxu0 }
 0x7a0   :  { %v2202_v10 = vpop.f32.mrb[25].mxu0 }
 0x7a1   :  { %v864_v50 = vpop.f32.mrb[26].mxu0 }
 0x7a2   :  { %v2387_v13 = vpack.i.bf16 %v864_v50, %v861_v51  ;;  %v2203_v14 = vpop.f32.mrb[27].mxu0 }
 0x7a3   :  { %v2443_v14 = vld [vmem:[#allocation2 + $0x60] sm:$0xff]  }
 0x7a4   :  { %2388 = vrot.lane.b32.xlu1 %v2387_v13, %s2592_s13  ;;  %2265 = vmatpush3.bf16.msra.mxu0 %v2443_v14 }
 0x7a5   :  { %2266 = vmatprep.subr.bf16.mxu0 %v2580_v0 }
 0x7a7   :  { %v982_v15 = vpop.f32.mrb[28].mxu0 }
 0x7a8   :  { %v2214_v16 = vpop.f32.mrb[29].mxu0 }
 0x7a9   :  { %v985_v20 = vpop.f32.mrb[30].mxu0  ;;  %v2445_v16 = vld [vmem:[#allocation2 + $0x70] sm:$0xff]  }
 0x7aa   :  { %v2392_v59 = vpack.i.bf16 %v985_v20, %v982_v15  ;;  %v2215_v22 = vpop.f32.mrb[31].mxu0  ;;  %v2444_v15 = vld [vmem:[#allocation2 + $0x68] sm:$0xff]   ;;  %v1314_v20 = vld [vmem:[%s3115_s5 + $0x2] ss:$0 sm:$0xff] }
 0x7ab   :  { %2267 = vmatpush3.bf16.msra.mxu0 %v2444_v15 }
 0x7ac   :  { %2393 = vrot.lane.b32.xlu0 %v2392_v59, %s2590_s12  ;;  %2292 = vmatprep.subr.bf16.mxu0 %v2580_v0 }
 0x7af   :  { %v1103_v24 = vpop.f32.mrb[32].mxu0 }
 0x7b0   :  { %v2226_v23 = vpop.f32.mrb[33].mxu0 }
 0x7b1   :  { %v1106_v30 = vpop.f32.mrb[34].mxu0 }
 0x7b2   :  { %v2397_v27 = vpack.i.bf16 %v1106_v30, %v1103_v24  ;;  %v2227_v31 = vpop.f32.mrb[35].mxu0 }
 0x7b3   :  { %v2448_v31 = vld [vmem:[#allocation2 + $0x88] sm:$0xff]  }
 0x7b4   :  { %2398 = vrot.lane.b32.xlu1 %v2397_v27, %s2589_s11  ;;  %v2447_v27 = vld [vmem:[#allocation2 + $0x80] sm:$0xff]  }
 0x7b7   :  { %v1224_v35 = vpop.f32.mrb[36].mxu0 }
 0x7b8   :  { %v2238_v37 = vpop.f32.mrb[37].mxu0 }
 0x7b9   :  { %v1227_v38 = vpop.f32.mrb[38].mxu0  ;;  %v2452_v37 = vld [vmem:[#allocation2 + $0xa8] sm:$0xff]  }
 0x7ba   :  { %v2402_v40 = vpack.i.bf16 %v1227_v38, %v1224_v35  ;;  %v2239_v12 = vpop.f32.mrb[39].mxu0  ;;  %v2451_v35 = vld [vmem:[#allocation2 + $0xa0] sm:$0xff]   ;;  %v2453_v38 = vld [vmem:[#allocation2 + $0xb0] sm:$0xff]  }
 0x7bb   :  { %v1401_v12 = vld [vmem:[%s3115_s5 + $0x3] ss:$0 sm:$0xff] }
 0x7bc   :  { %2403 = vrot.lane.b32.xlu0 %v2402_v40, %s2583_s29  ;;  %v2454_v40 = vld [vmem:[#allocation2 + $0xb8] sm:$0xff]  }
 0x7e1   :  { %v2374_v46 = vpop.permute.xlu0 %2373 }
 0x7e2   :  { %v2376_v54 = vunpack.i.h.bf16 %v2374_v46  ;;  %v2375_v48 = vunpack.i.l.bf16 %v2374_v46 }
 0x7e4   :  { %v1288_v53 = vsel %vm266_vm2, %v2827_v44, %v2376_v54  ;;  %v1287_v61 = vsel %vm266_vm2, %v2825_v41, %v2375_v48 }
 0x7e9   :  { %v2379_v17 = vpop.permute.xlu1 %2378 }
 0x7ea   :  { %v2381_v49 = vunpack.i.h.bf16 %v2379_v17  ;;  %v2380_v52 = vunpack.i.l.bf16 %v2379_v17 }
 0x7ec   :  { %v1290_v2 = vsel %vm314_vm3, %v1288_v53, %v2381_v49  ;;  %v1289_v4 = vsel %vm314_vm3, %v1287_v61, %v2380_v52  ;;  %v2456_v53 = vld [vmem:[#allocation2 + $0xc8] sm:$0xff]   ;;  %v2457_v61 = vld [vmem:[#allocation2 + $0xd0] sm:$0xff]  }
 0x806   :  { %v2384_v19 = vpop.permute.xlu0 %2383 }
 0x807   :  { %v2386_v26 = vunpack.i.h.bf16 %v2384_v19  ;;  %v2385_v29 = vunpack.i.l.bf16 %v2384_v19 }
 0x809   :  { %v1293_v6 = vsel %vm1291_vm4, %v1290_v2, %v2386_v26  ;;  %v1292_v1 = vsel %vm1291_vm4, %v1289_v4, %v2385_v29  ;;  %v2460_v2 = vld [vmem:[#allocation2 + $0xe8] sm:$0xff]   ;;  %v2461_v4 = vld [vmem:[#allocation2 + $0xf0] sm:$0xff]  }
 0x816   :  { %v2389_v47 = vpop.permute.xlu1 %2388 }
 0x817   :  { %v2391_v55 = vunpack.i.h.bf16 %v2389_v47  ;;  %v2390_v60 = vunpack.i.l.bf16 %v2389_v47 }
 0x819   :  { %v1295_v36 = vsel %vm58_vm1, %v1293_v6, %v2391_v55  ;;  %v1294_v7 = vsel %vm58_vm1, %v1292_v1, %v2390_v60  ;;  %v2455_v60 = vld [vmem:[#allocation2 + $0xc0] sm:$0xff]  }
 0x81e   :  { %v2394_v56 = vpop.permute.xlu0 %2393 }
 0x81f   :  { %v2396_v62 = vunpack.i.h.bf16 %v2394_v56  ;;  %v2395_v63 = vunpack.i.l.bf16 %v2394_v56 }
 0x821   :  { %v1298_v8 = vsel %vm1296_vm5, %v1295_v36, %v2396_v62  ;;  %v1297_v41 = vsel %vm1296_vm5, %v1294_v7, %v2395_v63  ;;  %v2458_v62 = vld [vmem:[#allocation2 + $0xd8] sm:$0xff]   ;;  %v2459_v63 = vld [vmem:[#allocation2 + $0xe0] sm:$0xff]  }
 0x826   :  { %v2399_v39 = vpop.permute.xlu1 %2398 }
 0x827   :  { %v2401_v58 = vunpack.i.h.bf16 %v2399_v39  ;;  %v2400_v57 = vunpack.i.l.bf16 %v2399_v39 }
 0x829   :  { %v1301_v51 = vsel %vm1299_vm6, %v1298_v8, %v2401_v58  ;;  %v1300_v10 = vsel %vm1299_vm6, %v1297_v41, %v2400_v57  ;;  %v2462_v58 = vld [vmem:[#allocation2 + $0xf8] sm:$0xff]   ;;  %v1520_v57 = vld [vmem:[%s3115_s5 + $0x4] ss:$0 sm:$0xff] }
 0x82e   :  { %v2404_v44 = vpop.permute.xlu0 %2403 }
 0x82f   :  { %v2406_v3 = vunpack.i.h.bf16 %v2404_v44  ;;  %v2405_v5 = vunpack.i.l.bf16 %v2404_v44 }
 0x831   :  { %v1304_v50 = vsel %vm1302_vm7, %v1301_v51, %v2406_v3  ;;  %v1303_v11 = vsel %vm1302_vm7, %v1300_v10, %v2405_v5 }
 0x832   :  { %v1305_v13 = vpack.c.bf16 %v1304_v50, %v1303_v11 }
 0x834   :  { %2249 = vmatmul.mubr.msk.bf16.vlgmr.msra.gmra.mrb[32].mxu1 %vm1339_vm8, %v1305_v13 }
 0x835   :  { %2288 = vmatprep.mubr.msk.bf16.mxu1 %vm2581_vm0, %v2580_v0  ;;  %2273 = vmatpush3.bf16.msra.mxu1 %v2445_v16 }
 0x836   :  { %2274 = vmatprep.subr.bf16.mxu1 %v2580_v0 }
 0x839   :  { %2275 = vmatpush3.bf16.msra.mxu1 %v2446_v18  ;;  %v2463_v18 = vld [vmem:[#allocation2 + $0x100] sm:$0xff]  }
 0x83a   :  { %2276 = vmatprep.subr.bf16.mxu1 %v2580_v0 }
 0x83d   :  { %2277 = vmatpush3.bf16.msra.mxu1 %v2447_v27  ;;  %v2472_v27 = vld [vmem:[#allocation2 + $0x148] sm:$0xff]  }
 0x83e   :  { %2278 = vmatprep.subr.bf16.mxu1 %v2580_v0 }
 0x841   :  { %2279 = vmatpush3.bf16.msra.mxu1 %v2448_v31  ;;  %v2473_v31 = vld [vmem:[#allocation2 + $0x150] sm:$0xff]  }
 0x842   :  { %2280 = vmatprep.subr.bf16.mxu1 %v2580_v0 }
 0x845   :  { %2281 = vmatpush3.bf16.msra.mxu1 %v2449_v34  ;;  %v2474_v34 = vld [vmem:[#allocation2 + $0x158] sm:$0xff]  }
 0x846   :  { %2282 = vmatprep.subr.bf16.mxu1 %v2580_v0 }
 0x849   :  { %2283 = vmatpush3.bf16.msra.mxu1 %v2450_v25  ;;  %v1639_v25 = vld [vmem:[%s3115_s5 + $0x5] ss:$0 sm:$0xff] }
 0x84a   :  { %2284 = vmatprep.subr.bf16.mxu1 %v2580_v0 }
 0x84d   :  { %2285 = vmatpush3.bf16.msra.mxu1 %v2451_v35 }
 0x84e   :  { %2286 = vmatprep.subr.bf16.mxu1 %v2580_v0 }
 0x851   :  { %2287 = vmatpush3.bf16.msra.mxu1 %v2452_v37 }
 0x852   :  { %2312 = vmatprep.subr.bf16.mxu1 %v2580_v0 }
 0x907   :  { %v1377_v59 = vpop.f32.mrb[32].mxu1 }
 0x908   :  { %v2250_v22 = vpop.f32.mrb[33].mxu1  ;;  %v1378_v24 = vadd.f32 %v1377_v59, %v1314_v20  ;;  %v2465_v59 = vld [vmem:[#allocation2 + $0x110] sm:$0xff]  }
 0x909   :  { %v1380_v21 = vpop.f32.mrb[34].mxu1  ;;  %v2466_v22 = vld [vmem:[#allocation2 + $0x118] sm:$0xff]  }
 0x90a   :  { %v1381_v23 = vadd.f32 %v1380_v21, %v1314_v20  ;;  %v2251_v28 = vpop.f32.mrb[35].mxu1  ;;  %v2464_v20 = vld [vmem:[#allocation2 + $0x108] sm:$0xff]   ;;  %v2467_v21 = vld [vmem:[#allocation2 + $0x120] sm:$0xff]  }
 0x90b   :  { %v2470_v28 = vld [vmem:[#allocation2 + $0x138] sm:$0xff]  }
 0x90c   :  { %v1384_v30 = vpack.c.bf16 %v1381_v23, %v1378_v24  ;;  %v2468_v24 = vld [vmem:[#allocation2 + $0x128] sm:$0xff]   ;;  %v2469_v23 = vld [vmem:[#allocation2 + $0x130] sm:$0xff]  }
 0x90e   :  { %2269 = vmatmul.mubr.bf16.vlgmr.msra.gmra.mrb[40].mxu0 %v1384_v30  ;;  %v2471_v30 = vld [vmem:[#allocation2 + $0x140] sm:$0xff]  }
 0x90f   :  { %2308 = vmatprep.mubr.msk.bf16.mxu0 %vm2581_vm0, %v2580_v0  ;;  %2293 = vmatpush3.bf16.msra.mxu0 %v2453_v38 }
 0x910   :  { %2294 = vmatprep.subr.bf16.mxu0 %v2580_v0 }
 0x913   :  { %2295 = vmatpush3.bf16.msra.mxu0 %v2454_v40 }
 0x914   :  { %2296 = vmatprep.subr.bf16.mxu0 %v2580_v0 }
 0x917   :  { %2297 = vmatpush3.bf16.msra.mxu0 %v2455_v60 }
 0x918   :  { %2298 = vmatprep.subr.bf16.mxu0 %v2580_v0 }
 0x91b   :  { %2299 = vmatpush3.bf16.msra.mxu0 %v2456_v53 }
 0x91c   :  { %2300 = vmatprep.subr.bf16.mxu0 %v2580_v0 }
 0x91f   :  { %2301 = vmatpush3.bf16.msra.mxu0 %v2457_v61 }
 0x920   :  { %2302 = vmatprep.subr.bf16.mxu0 %v2580_v0 }
 0x923   :  { %2303 = vmatpush3.bf16.msra.mxu0 %v2458_v62 }
 0x924   :  { %2304 = vmatprep.subr.bf16.mxu0 %v2580_v0 }
 0x927   :  { %2305 = vmatpush3.bf16.msra.mxu0 %v2459_v63 }
 0x928   :  { %2306 = vmatprep.subr.bf16.mxu0 %v2580_v0 }
 0x92b   :  { %2307 = vmatpush3.bf16.msra.mxu0 %v2460_v2 }
 0x92c   :  { %2332 = vmatprep.subr.bf16.mxu0 %v2580_v0 }
 0x9e1   :  { %v1484_v42 = vpop.f32.mrb[40].mxu0 }
 0x9e2   :  { %v1485_v9 = vadd.f32 %v1484_v42, %v1401_v12  ;;  %v2270_v43 = vpop.f32.mrb[41].mxu0 }
 0x9e3   :  { %v1487_v45 = vpop.f32.mrb[42].mxu0 }
 0x9e4   :  { %v1493_v46 = vmin.f32 %v1485_v9, 0.0  ;;  %v1488_v17 = vadd.f32 %v1487_v45, %v1401_v12  ;;  %v2271_v19 = vpop.f32.mrb[43].mxu0  ;;  %vm1491_vm9 = vcmp.gt.f32.partialorder %v1485_v9, 0.0 }
 0x9e6   :  { %v1495_v47 = vmul.f32 1.442695, %v1493_v46  ;;  %v1494_v54 = vmin.f32 %v1488_v17, 0.0  ;;  %vm1492_vm10 = vcmp.gt.f32.partialorder %v1488_v17, 0.0 }
 0x9e8   :  { %2541 = vpow2.f32 %v1495_v47  ;;  %v1497_v48 = vmul.f32 1.442695, %v1494_v54 }
 0x9ea   :  { %2543 = vpow2.f32 %v1497_v48 }
 0x9f2   :  { %v2542_v49 = vpop.eup %2541 }
 0x9f3   :  { %v2013_v52 = vadd.f32 -1.0, %v2542_v49 }
 0x9f4   :  { %v2544_v56 = vpop.eup %2543 }
 0x9f5   :  { %v2014_v26 = vadd.f32 -1.0, %v2544_v56  ;;  %v1501_v29 = vsel %vm1491_vm9, %v1485_v9, %v2013_v52  ;;  %v2475_v56 = vld [vmem:[#allocation2 + $0x160] sm:$0xff]  }
 0x9f7   :  { %v1502_v39 = vsel %vm1492_vm10, %v1488_v17, %v2014_v26  ;;  %v2476_v26 = vld [vmem:[#allocation2 + $0x168] sm:$0xff]  }
 0x9f8   :  { %v1503_v55 = vpack.c.bf16 %v1502_v39, %v1501_v29  ;;  %v1758_v29 = vld [vmem:[%s3115_s5 + $0x6] ss:$0 sm:$0xff] }
 0x9fa   :  { %2289 = vmatmul.mubr.bf16.vlgmr.msra.gmra.mrb[36].mxu1 %v1503_v55 }
 0x9fb   :  { %2328 = vmatprep.mubr.msk.bf16.mxu1 %vm2581_vm0, %v2580_v0  ;;  %2313 = vmatpush3.bf16.msra.mxu1 %v2461_v4 }
 0x9fc   :  { %2314 = vmatprep.subr.bf16.mxu1 %v2580_v0 }
 0x9ff   :  { %2315 = vmatpush3.bf16.msra.mxu1 %v2462_v58 }
 0xa00   :  { %2316 = vmatprep.subr.bf16.mxu1 %v2580_v0 }
 0xa03   :  { %2317 = vmatpush3.bf16.msra.mxu1 %v2463_v18 }
 0xa04   :  { %2318 = vmatprep.subr.bf16.mxu1 %v2580_v0 }
 0xa07   :  { %2319 = vmatpush3.bf16.msra.mxu1 %v2464_v20 }
 0xa08   :  { %2320 = vmatprep.subr.bf16.mxu1 %v2580_v0 }
 0xa0b   :  { %2321 = vmatpush3.bf16.msra.mxu1 %v2465_v59 }
 0xa0c   :  { %2322 = vmatprep.subr.bf16.mxu1 %v2580_v0 }
 0xa0f   :  { %2323 = vmatpush3.bf16.msra.mxu1 %v2466_v22 }
 0xa10   :  { %2324 = vmatprep.subr.bf16.mxu1 %v2580_v0 }
 0xa13   :  { %2325 = vmatpush3.bf16.msra.mxu1 %v2467_v21 }
 0xa14   :  { %2326 = vmatprep.subr.bf16.mxu1 %v2580_v0 }
 0xa17   :  { %2327 = vmatpush3.bf16.msra.mxu1 %v2468_v24 }
 0xacd   :  { %v1603_v6 = vpop.f32.mrb[36].mxu1 }
 0xace   :  { %v1604_v1 = vadd.f32 %v1603_v6, %v1520_v57  ;;  %v2290_v36 = vpop.f32.mrb[37].mxu1 }
 0xacf   :  { %v1606_v7 = vpop.f32.mrb[38].mxu1 }
 0xad0   :  { %v1612_v44 = vmin.f32 %v1604_v1, 0.0  ;;  %v1607_v8 = vadd.f32 %v1606_v7, %v1520_v57  ;;  %v2291_v41 = vpop.f32.mrb[39].mxu1  ;;  %vm1610_vm11 = vcmp.gt.f32.partialorder %v1604_v1, 0.0 }
 0xad2   :  { %v1614_v3 = vmul.f32 1.442695, %v1612_v44  ;;  %v1613_v5 = vmin.f32 %v1607_v8, 0.0  ;;  %vm1611_vm12 = vcmp.gt.f32.partialorder %v1607_v8, 0.0 }
 0xad4   :  { %2545 = vpow2.f32 %v1614_v3  ;;  %v1616_v51 = vmul.f32 1.442695, %v1613_v5 }
 0xad6   :  { %2547 = vpow2.f32 %v1616_v51 }
 0xade   :  { %v2546_v10 = vpop.eup %2545 }
 0xadf   :  { %v2023_v50 = vadd.f32 -1.0, %v2546_v10 }
 0xae0   :  { %v2548_v11 = vpop.eup %2547 }
 0xae1   :  { %v2024_v13 = vadd.f32 -1.0, %v2548_v11  ;;  %v1620_v14 = vsel %vm1610_vm11, %v1604_v1, %v2023_v50 }
 0xae3   :  { %v1621_v15 = vsel %vm1611_vm12, %v1607_v8, %v2024_v13 }
 0xae4   :  { %v1622_v16 = vpack.c.bf16 %v1621_v15, %v1620_v14 }
 0xae6   :  { %2309 = vmatmul.mubr.bf16.vlgmr.msra.gmra.mrb[44].mxu0 %v1622_v16 }
 0xae7   :  { %2348 = vmatprep.mubr.msk.bf16.mxu0 %vm2581_vm0, %v2580_v0  ;;  %2333 = vmatpush3.bf16.msra.mxu0 %v2469_v23 }
 0xae8   :  { %2334 = vmatprep.subr.bf16.mxu0 %v2580_v0 }
 0xaeb   :  { %2335 = vmatpush3.bf16.msra.mxu0 %v2470_v28 }
 0xaec   :  { %2336 = vmatprep.subr.bf16.mxu0 %v2580_v0 }
 0xaef   :  { %2337 = vmatpush3.bf16.msra.mxu0 %v2471_v30 }
 0xaf0   :  { %2338 = vmatprep.subr.bf16.mxu0 %v2580_v0 }
 0xaf3   :  { %2339 = vmatpush3.bf16.msra.mxu0 %v2472_v27 }
 0xaf4   :  { %2340 = vmatprep.subr.bf16.mxu0 %v2580_v0 }
 0xaf7   :  { %2341 = vmatpush3.bf16.msra.mxu0 %v2473_v31 }
 0xaf8   :  { %2342 = vmatprep.subr.bf16.mxu0 %v2580_v0 }
 0xafb   :  { %2343 = vmatpush3.bf16.msra.mxu0 %v2474_v34 }
 0xafc   :  { %2344 = vmatprep.subr.bf16.mxu0 %v2580_v0 }
 0xaff   :  { %2345 = vmatpush3.bf16.msra.mxu0 %v2475_v56 }
 0xb00   :  { %2346 = vmatprep.subr.bf16.mxu0 %v2580_v0  ;;  %v1867_v0 = vld [vmem:[%s3115_s5 + $0x7] ss:$0 sm:$0xff] }
 0xb03   :  { %2347 = vmatpush3.bf16.msra.mxu0 %v2476_v26 }
 0xbb9   :  { %v1722_v35 = vpop.f32.mrb[44].mxu0 }
 0xbba   :  { %v1723_v37 = vadd.f32 %v1722_v35, %v1639_v25  ;;  %v2310_v38 = vpop.f32.mrb[45].mxu0 }
 0xbbb   :  { %v1725_v40 = vpop.f32.mrb[46].mxu0 }
 0xbbc   :  { %v1731_v12 = vmin.f32 %v1723_v37, 0.0  ;;  %v1726_v42 = vadd.f32 %v1725_v40, %v1639_v25  ;;  %v2311_v9 = vpop.f32.mrb[47].mxu0  ;;  %vm1729_vm13 = vcmp.gt.f32.partialorder %v1723_v37, 0.0 }
 0xbbe   :  { %v1733_v43 = vmul.f32 1.442695, %v1731_v12  ;;  %v1732_v45 = vmin.f32 %v1726_v42, 0.0  ;;  %vm1730_vm14 = vcmp.gt.f32.partialorder %v1726_v42, 0.0 }
 0xbc0   :  { %2549 = vpow2.f32 %v1733_v43  ;;  %v1735_v46 = vmul.f32 1.442695, %v1732_v45 }
 0xbc2   :  { %2551 = vpow2.f32 %v1735_v46 }
 0xbca   :  { %v2550_v17 = vpop.eup %2549 }
 0xbcb   :  { %v2033_v19 = vadd.f32 -1.0, %v2550_v17 }
 0xbcc   :  { %v2552_v47 = vpop.eup %2551 }
 0xbcd   :  { %v2034_v54 = vadd.f32 -1.0, %v2552_v47  ;;  %v1739_v48 = vsel %vm1729_vm13, %v1723_v37, %v2033_v19 }
 0xbcf   :  { %v1740_v49 = vsel %vm1730_vm14, %v1726_v42, %v2034_v54 }
 0xbd0   :  { %v1741_v52 = vpack.c.bf16 %v1740_v49, %v1739_v48 }
 0xbd2   :  { %2329 = vmatmul.mubr.bf16.vlgmr.msra.gmra.mrb[40].mxu1 %v1741_v52 }
 0xca5   :  { %v1841_v39 = vpop.f32.mrb[40].mxu1 }
 0xca6   :  { %v1842_v55 = vadd.f32 %v1841_v39, %v1758_v29  ;;  %v2330_v60 = vpop.f32.mrb[41].mxu1 }
 0xca7   :  { %v1844_v53 = vpop.f32.mrb[42].mxu1 }
 0xca8   :  { %v1845_v61 = vadd.f32 %v1844_v53, %v1758_v29  ;;  %v2331_v62 = vpop.f32.mrb[43].mxu1  ;;  %v1848_v63 = vadd.f32 %v1842_v55, %v2718_v32 }
 0xcaa   :  { %v1849_v2 = vadd.f32 %v1845_v61, %v2720_v33 }
 0xcac   :  { %v1850_v4 = vpack.c.bf16 %v1849_v2, %v1848_v63 }
 0xcae   :  { %2349 = vmatmul.mubr.bf16.vlgmr.msra.gmra.mrb[48].mxu0 %v1850_v4 }
 0xd81   :  { %v1950_v58 = vpop.f32.mrb[48].mxu0 }
 0xd82   :  { %v1951_v57 = vadd.f32 %v1950_v58, %v1867_v0  ;;  %v2350_v6 = vpop.f32.mrb[49].mxu0 }
 0xd83   :  { %v1953_v1 = vpop.f32.mrb[50].mxu0 }
 0xd84   :  { %1957 = vst [vmem:[%s3116_s6] sm:$0xff] %v1951_v57  ;;  %v1954_v36 = vadd.f32 %v1953_v1, %v1867_v0  ;;  %v2351_v7 = vpop.f32.mrb[51].mxu0 }
 0xd86   :  { %1958 = vst [vmem:[%s3116_s6 + $0x8] sm:$0xff] %v1954_v36 }
 0xd87   :  { %1963 = vsyncpa [#allocation3], 1 }

</bundles_post_ra>
